<compile_context>
chip_gen: v6e
topology: v6e:2x2x1
jax: 0.10.0
libtpu: 0.0.40
codegen_flags: <defaults>
</compile_context>

<pallas_src>
import jax
import jax.numpy as jnp
from jax.experimental import pallas as pl
from jax.experimental.pallas import tpu as pltpu


def _lstm_kernel(x_ref, wih_ref, whh_ref, b_ref, h_out_ref, pre_scr):
    """Whole LSTM forward in one kernel invocation.

    x_ref    : (B, T, I)     full input sequence (tiny, resident in VMEM)
    wih_ref  : (I, 4*Hp)     gate-padded W_ih^T
    whh_ref  : (Hp, 4*Hp)    gate-padded W_hh^T (input rows H:Hp are zero)
    b_ref    : (1, 4*Hp)     gate-padded combined bias (b_ih + b_hh)
    h_out_ref: (B, H)        final hidden state
    pre_scr  : (T, B, 4*Hp)  VMEM scratch holding the hoisted input projections
    """
    B, T, _ = x_ref.shape
    G = wih_ref.shape[-1]
    Hp = G // 4
    H = h_out_ref.shape[-1]

    # ---- hoisted input projection (independent of the recurrence) ----------
    xv = x_ref[...]                      # (B, T, I), 256 B
    wih = wih_ref[...]                   # (I, 4*Hp) -- small, fine to keep live
    bias = b_ref[...]                    # (1, 4*Hp)
    for t in range(T):                   # static unroll; all dots independent
        pre_scr[t] = (
            jnp.dot(xv[:, t, :], wih, preferred_element_type=jnp.float32) + bias
        )

    # ---- serial recurrence: only h @ W_hh^T is on the dependent chain ------
    def step(t, carry):
        h, c = carry
        gates = pre_scr[t] + jnp.dot(
            h, whh_ref[...], preferred_element_type=jnp.float32
        )                                # (B, 4*Hp)
        # 128-lane-aligned gate slices (torch gate order i, f, g, o)
        i_g = jax.nn.sigmoid(gates[:, 0 * Hp:1 * Hp])
        f_g = jax.nn.sigmoid(gates[:, 1 * Hp:2 * Hp])
        g_g = jnp.tanh(gates[:, 2 * Hp:3 * Hp])
        o_g = jax.nn.sigmoid(gates[:, 3 * Hp:4 * Hp])
        c_new = f_g * c + i_g * g_g      # padded lanes stay exactly 0
        h_new = o_g * jnp.tanh(c_new)
        return h_new, c_new

    h0 = jnp.zeros((B, Hp), jnp.float32)
    c0 = jnp.zeros((B, Hp), jnp.float32)
    h_fin, _ = jax.lax.fori_loop(0, T, step, (h0, c0), unroll=True)

    h_out_ref[...] = h_fin[:, :H].astype(h_out_ref.dtype)


def encoder_forward(x, w_ih, w_hh, b_ih, b_hh):
    """x: (B, T, I) float32. Returns final hidden state (B, H), matching
    PyTorch `_, (hidden, _) = lstm(x); return hidden.squeeze(0)`."""
    B, T, I = x.shape
    four_h = w_ih.shape[0]
    H = four_h // 4
    Hp = ((H + 127) // 128) * 128        # lane-aligned per-gate width
    G = 4 * Hp
    f32 = jnp.float32

    # ---- one-time parameter prep: transpose + pad each gate to Hp lanes ----
    wih_g = w_ih.astype(f32).reshape(4, H, I)
    wih_p = jnp.zeros((4, Hp, I), f32).at[:, :H, :].set(wih_g)
    wih_p = jnp.transpose(wih_p, (2, 0, 1)).reshape(I, G)        # (I, 4*Hp)

    whh_g = w_hh.astype(f32).reshape(4, H, H)
    whh_p = jnp.zeros((4, Hp, H), f32).at[:, :H, :].set(whh_g)
    whh_p = jnp.transpose(whh_p, (2, 0, 1)).reshape(H, G)        # (H, 4*Hp)
    whh_p = jnp.zeros((Hp, G), f32).at[:H, :].set(whh_p)         # (Hp, 4*Hp)

    bias = (b_ih + b_hh).astype(f32).reshape(4, H)
    bias_p = jnp.zeros((4, Hp), f32).at[:, :H].set(bias).reshape(1, G)

    grid_spec = pltpu.PrefetchScalarGridSpec(
        num_scalar_prefetch=0,
        grid=(1,),                                    # whole sequence, one shot
        in_specs=[
            pl.BlockSpec((B, T, I), lambda i: (0, 0, 0)),   # x, whole array
            pl.BlockSpec((I, G), lambda i: (0, 0)),          # W_ih^T (padded)
            pl.BlockSpec((Hp, G), lambda i: (0, 0)),         # W_hh^T (padded)
            pl.BlockSpec((1, G), lambda i: (0, 0)),          # bias   (padded)
        ],
        out_specs=pl.BlockSpec((B, H), lambda i: (0, 0)),
        scratch_shapes=[
            pltpu.VMEM((T, B, G), jnp.float32),       # hoisted input projections
        ],
    )

    # TODO(synk): if H ever grows large (e.g. >=1024), cast resident weights to
    # bf16 on v6e/v7x and tile the 4H axis to respect v7x's 64 MiB VMEM.
    return pl.pallas_call(
        _lstm_kernel,
        out_shape=jax.ShapeDtypeStruct((B, H), f32),
        grid_spec=grid_spec,
        compiler_params=pltpu.CompilerParams(
            dimension_semantics=("arbitrary",),       # single sequential step
        ),
    )(x.astype(f32), wih_p, whh_p, bias_p)


def _reference_lstm(x, w_ih, w_hh, b_ih, b_hh):
    """Pure-JAX reference mirroring torch.nn.LSTM semantics (gate order i,f,g,o)."""
    B, T, I = x.shape
    H = w_hh.shape[1]
    h = jnp.zeros((B, H), jnp.float32)
    c = jnp.zeros((B, H), jnp.float32)
    for t in range(T):
        gates = (
            jnp.dot(x[:, t, :], w_ih.T, precision="highest")
            + jnp.dot(h, w_hh.T, precision="highest")
            + b_ih + b_hh
        )
        i_g = jax.nn.sigmoid(gates[:, 0 * H:1 * H])
        f_g = jax.nn.sigmoid(gates[:, 1 * H:2 * H])
        g_g = jnp.tanh(gates[:, 2 * H:3 * H])
        o_g = jax.nn.sigmoid(gates[:, 3 * H:4 * H])
        c = f_g * c + i_g * g_g
        h = o_g * jnp.tanh(c)
    return h


if __name__ == "__main__":
    # Small shapes consistent with the module: input_size=4, hidden_size=64
    B, T, I, H = 2, 8, 4, 64

    key = jax.random.PRNGKey(0)
    kx, k1, k2, k3, k4 = jax.random.split(key, 5)

    # Deterministic synthetic parameters (uniform like torch's default init scale)
    bound = 1.0 / jnp.sqrt(H)
    x = jax.random.normal(kx, (B, T, I), jnp.float32)
    w_ih = jax.random.uniform(k1, (4 * H, I), jnp.float32, -bound, bound)
    w_hh = jax.random.uniform(k2, (4 * H, H), jnp.float32, -bound, bound)
    b_ih = jax.random.uniform(k3, (4 * H,), jnp.float32, -bound, bound)
    b_hh = jax.random.uniform(k4, (4 * H,), jnp.float32, -bound, bound)

    out = encoder_forward(x, w_ih, w_hh, b_ih, b_hh)
    out = jax.block_until_ready(out)

    ref = _reference_lstm(x, w_ih, w_hh, b_ih, b_hh)
    assert out.shape == (B, H)
    assert jnp.allclose(out, ref, atol=1e-5, rtol=1e-5), "mismatch vs reference"

    print("KERNEL_OK")
</pallas_src>

<mosaic_0001>
module attributes {stable_mosaic.version = 11 : i64} {
  func.func @_lstm_kernel(%arg0: i32, %arg1: memref<2x8x4xf32, #tpu.memory_space<vmem>>, %arg2: memref<4x512xf32, #tpu.memory_space<vmem>>, %arg3: memref<128x512xf32, #tpu.memory_space<vmem>>, %arg4: memref<1x512xf32, #tpu.memory_space<vmem>>, %arg5: memref<2x64xf32, #tpu.memory_space<vmem>>, %arg6: memref<8x2x512xf32, #tpu.memory_space<vmem>>) attributes {dimension_semantics = [#tpu.dimension_semantics<arbitrary>], iteration_bounds = array<i64: 1>, scalar_prefetch = 0 : i64, scratch_operands = 1 : i64, tpu.core_type = #tpu.core_type<tc>, window_params = [{pipeline_mode = #tpu.pipeline_mode<synchronous>, transform_indices = @transform_0, window_bounds = array<i64: 2, 8, 4>}, {pipeline_mode = #tpu.pipeline_mode<synchronous>, transform_indices = @transform_1, window_bounds = array<i64: 4, 512>}, {pipeline_mode = #tpu.pipeline_mode<synchronous>, transform_indices = @transform_2, window_bounds = array<i64: 128, 512>}, {pipeline_mode = #tpu.pipeline_mode<synchronous>, transform_indices = @transform_3, window_bounds = array<i64: 1, 512>}, {pipeline_mode = #tpu.pipeline_mode<synchronous>, transform_indices = @transform_4, window_bounds = array<i64: 2, 64>}]} {
    %c0 = arith.constant 0 : index
    %c0_0 = arith.constant 0 : index
    %c0_1 = arith.constant 0 : index
    %0 = vector.load %arg1[%c0, %c0_0, %c0_1] : memref<2x8x4xf32, #tpu.memory_space<vmem>>, vector<2x8x4xf32>
    %c0_2 = arith.constant 0 : index
    %c0_3 = arith.constant 0 : index
    %1 = vector.load %arg2[%c0_2, %c0_3] : memref<4x512xf32, #tpu.memory_space<vmem>>, vector<4x512xf32>
    %c0_4 = arith.constant 0 : index
    %c0_5 = arith.constant 0 : index
    %2 = vector.load %arg4[%c0_4, %c0_5] : memref<1x512xf32, #tpu.memory_space<vmem>>, vector<1x512xf32>
    %3 = vector.extract_strided_slice %0 {offsets = [0, 0, 0], sizes = [2, 1, 4], strides = [1, 1, 1]} : vector<2x8x4xf32> to vector<2x1x4xf32>
    %4 = vector.shape_cast %3 : vector<2x1x4xf32> to vector<2x4xf32>
    %cst = arith.constant dense<0.000000e+00> : vector<2x512xf32>
    %5 = tpu.matmul %4, %1, %cst {dimension_numbers = #tpu.dot_dimension_numbers<[1], [0], [0], [1], [0, 0, 1, 1], [], []>} : vector<2x4xf32>, vector<4x512xf32>, vector<2x512xf32> -> vector<2x512xf32>
    %6 = vector.broadcast %2 : vector<1x512xf32> to vector<2x512xf32>
    %7 = arith.addf %5, %6 : vector<2x512xf32>
    %c0_6 = arith.constant 0 : index
    %c0_7 = arith.constant 0 : index
    %c0_8 = arith.constant 0 : index
    %8 = vector.load %arg6[%c0_6, %c0_7, %c0_8] : memref<8x2x512xf32, #tpu.memory_space<vmem>>, vector<1x2x512xf32>
    %9 = vector.shape_cast %8 : vector<1x2x512xf32> to vector<2x512xf32>
    %10 = vector.shape_cast %7 : vector<2x512xf32> to vector<1x2x512xf32>
    tpu.vector_store %arg6[%c0_6, %c0_7, %c0_8], %10 {strides = array<i32>} : memref<8x2x512xf32, #tpu.memory_space<vmem>>, vector<1x2x512xf32>,
    %11 = vector.extract_strided_slice %0 {offsets = [0, 1, 0], sizes = [2, 1, 4], strides = [1, 1, 1]} : vector<2x8x4xf32> to vector<2x1x4xf32>
    %12 = vector.shape_cast %11 : vector<2x1x4xf32> to vector<2x4xf32>
    %cst_9 = arith.constant dense<0.000000e+00> : vector<2x512xf32>
    %13 = tpu.matmul %12, %1, %cst_9 {dimension_numbers = #tpu.dot_dimension_numbers<[1], [0], [0], [1], [0, 0, 1, 1], [], []>} : vector<2x4xf32>, vector<4x512xf32>, vector<2x512xf32> -> vector<2x512xf32>
    %14 = vector.broadcast %2 : vector<1x512xf32> to vector<2x512xf32>
    %15 = arith.addf %13, %14 : vector<2x512xf32>
    %c1 = arith.constant 1 : index
    %c0_10 = arith.constant 0 : index
    %c0_11 = arith.constant 0 : index
    %16 = vector.load %arg6[%c1, %c0_10, %c0_11] : memref<8x2x512xf32, #tpu.memory_space<vmem>>, vector<1x2x512xf32>
    %17 = vector.shape_cast %16 : vector<1x2x512xf32> to vector<2x512xf32>
    %18 = vector.shape_cast %15 : vector<2x512xf32> to vector<1x2x512xf32>
    tpu.vector_store %arg6[%c1, %c0_10, %c0_11], %18 {strides = array<i32>} : memref<8x2x512xf32, #tpu.memory_space<vmem>>, vector<1x2x512xf32>,
    %19 = vector.extract_strided_slice %0 {offsets = [0, 2, 0], sizes = [2, 1, 4], strides = [1, 1, 1]} : vector<2x8x4xf32> to vector<2x1x4xf32>
    %20 = vector.shape_cast %19 : vector<2x1x4xf32> to vector<2x4xf32>
    %cst_12 = arith.constant dense<0.000000e+00> : vector<2x512xf32>
    %21 = tpu.matmul %20, %1, %cst_12 {dimension_numbers = #tpu.dot_dimension_numbers<[1], [0], [0], [1], [0, 0, 1, 1], [], []>} : vector<2x4xf32>, vector<4x512xf32>, vector<2x512xf32> -> vector<2x512xf32>
    %22 = vector.broadcast %2 : vector<1x512xf32> to vector<2x512xf32>
    %23 = arith.addf %21, %22 : vector<2x512xf32>
    %c2 = arith.constant 2 : index
    %c0_13 = arith.constant 0 : index
    %c0_14 = arith.constant 0 : index
    %24 = vector.load %arg6[%c2, %c0_13, %c0_14] : memref<8x2x512xf32, #tpu.memory_space<vmem>>, vector<1x2x512xf32>
    %25 = vector.shape_cast %24 : vector<1x2x512xf32> to vector<2x512xf32>
    %26 = vector.shape_cast %23 : vector<2x512xf32> to vector<1x2x512xf32>
    tpu.vector_store %arg6[%c2, %c0_13, %c0_14], %26 {strides = array<i32>} : memref<8x2x512xf32, #tpu.memory_space<vmem>>, vector<1x2x512xf32>,
    %27 = vector.extract_strided_slice %0 {offsets = [0, 3, 0], sizes = [2, 1, 4], strides = [1, 1, 1]} : vector<2x8x4xf32> to vector<2x1x4xf32>
    %28 = vector.shape_cast %27 : vector<2x1x4xf32> to vector<2x4xf32>
    %cst_15 = arith.constant dense<0.000000e+00> : vector<2x512xf32>
    %29 = tpu.matmul %28, %1, %cst_15 {dimension_numbers = #tpu.dot_dimension_numbers<[1], [0], [0], [1], [0, 0, 1, 1], [], []>} : vector<2x4xf32>, vector<4x512xf32>, vector<2x512xf32> -> vector<2x512xf32>
    %30 = vector.broadcast %2 : vector<1x512xf32> to vector<2x512xf32>
    %31 = arith.addf %29, %30 : vector<2x512xf32>
    %c3 = arith.constant 3 : index
    %c0_16 = arith.constant 0 : index
    %c0_17 = arith.constant 0 : index
    %32 = vector.load %arg6[%c3, %c0_16, %c0_17] : memref<8x2x512xf32, #tpu.memory_space<vmem>>, vector<1x2x512xf32>
    %33 = vector.shape_cast %32 : vector<1x2x512xf32> to vector<2x512xf32>
    %34 = vector.shape_cast %31 : vector<2x512xf32> to vector<1x2x512xf32>
    tpu.vector_store %arg6[%c3, %c0_16, %c0_17], %34 {strides = array<i32>} : memref<8x2x512xf32, #tpu.memory_space<vmem>>, vector<1x2x512xf32>,
    %35 = vector.extract_strided_slice %0 {offsets = [0, 4, 0], sizes = [2, 1, 4], strides = [1, 1, 1]} : vector<2x8x4xf32> to vector<2x1x4xf32>
    %36 = vector.shape_cast %35 : vector<2x1x4xf32> to vector<2x4xf32>
    %cst_18 = arith.constant dense<0.000000e+00> : vector<2x512xf32>
    %37 = tpu.matmul %36, %1, %cst_18 {dimension_numbers = #tpu.dot_dimension_numbers<[1], [0], [0], [1], [0, 0, 1, 1], [], []>} : vector<2x4xf32>, vector<4x512xf32>, vector<2x512xf32> -> vector<2x512xf32>
    %38 = vector.broadcast %2 : vector<1x512xf32> to vector<2x512xf32>
    %39 = arith.addf %37, %38 : vector<2x512xf32>
    %c4 = arith.constant 4 : index
    %c0_19 = arith.constant 0 : index
    %c0_20 = arith.constant 0 : index
    %40 = vector.load %arg6[%c4, %c0_19, %c0_20] : memref<8x2x512xf32, #tpu.memory_space<vmem>>, vector<1x2x512xf32>
    %41 = vector.shape_cast %40 : vector<1x2x512xf32> to vector<2x512xf32>
    %42 = vector.shape_cast %39 : vector<2x512xf32> to vector<1x2x512xf32>
    tpu.vector_store %arg6[%c4, %c0_19, %c0_20], %42 {strides = array<i32>} : memref<8x2x512xf32, #tpu.memory_space<vmem>>, vector<1x2x512xf32>,
    %43 = vector.extract_strided_slice %0 {offsets = [0, 5, 0], sizes = [2, 1, 4], strides = [1, 1, 1]} : vector<2x8x4xf32> to vector<2x1x4xf32>
    %44 = vector.shape_cast %43 : vector<2x1x4xf32> to vector<2x4xf32>
    %cst_21 = arith.constant dense<0.000000e+00> : vector<2x512xf32>
    %45 = tpu.matmul %44, %1, %cst_21 {dimension_numbers = #tpu.dot_dimension_numbers<[1], [0], [0], [1], [0, 0, 1, 1], [], []>} : vector<2x4xf32>, vector<4x512xf32>, vector<2x512xf32> -> vector<2x512xf32>
    %46 = vector.broadcast %2 : vector<1x512xf32> to vector<2x512xf32>
    %47 = arith.addf %45, %46 : vector<2x512xf32>
    %c5 = arith.constant 5 : index
    %c0_22 = arith.constant 0 : index
    %c0_23 = arith.constant 0 : index
    %48 = vector.load %arg6[%c5, %c0_22, %c0_23] : memref<8x2x512xf32, #tpu.memory_space<vmem>>, vector<1x2x512xf32>
    %49 = vector.shape_cast %48 : vector<1x2x512xf32> to vector<2x512xf32>
    %50 = vector.shape_cast %47 : vector<2x512xf32> to vector<1x2x512xf32>
    tpu.vector_store %arg6[%c5, %c0_22, %c0_23], %50 {strides = array<i32>} : memref<8x2x512xf32, #tpu.memory_space<vmem>>, vector<1x2x512xf32>,
    %51 = vector.extract_strided_slice %0 {offsets = [0, 6, 0], sizes = [2, 1, 4], strides = [1, 1, 1]} : vector<2x8x4xf32> to vector<2x1x4xf32>
    %52 = vector.shape_cast %51 : vector<2x1x4xf32> to vector<2x4xf32>
    %cst_24 = arith.constant dense<0.000000e+00> : vector<2x512xf32>
    %53 = tpu.matmul %52, %1, %cst_24 {dimension_numbers = #tpu.dot_dimension_numbers<[1], [0], [0], [1], [0, 0, 1, 1], [], []>} : vector<2x4xf32>, vector<4x512xf32>, vector<2x512xf32> -> vector<2x512xf32>
    %54 = vector.broadcast %2 : vector<1x512xf32> to vector<2x512xf32>
    %55 = arith.addf %53, %54 : vector<2x512xf32>
    %c6 = arith.constant 6 : index
    %c0_25 = arith.constant 0 : index
    %c0_26 = arith.constant 0 : index
    %56 = vector.load %arg6[%c6, %c0_25, %c0_26] : memref<8x2x512xf32, #tpu.memory_space<vmem>>, vector<1x2x512xf32>
    %57 = vector.shape_cast %56 : vector<1x2x512xf32> to vector<2x512xf32>
    %58 = vector.shape_cast %55 : vector<2x512xf32> to vector<1x2x512xf32>
    tpu.vector_store %arg6[%c6, %c0_25, %c0_26], %58 {strides = array<i32>} : memref<8x2x512xf32, #tpu.memory_space<vmem>>, vector<1x2x512xf32>,
    %59 = vector.extract_strided_slice %0 {offsets = [0, 7, 0], sizes = [2, 1, 4], strides = [1, 1, 1]} : vector<2x8x4xf32> to vector<2x1x4xf32>
    %60 = vector.shape_cast %59 : vector<2x1x4xf32> to vector<2x4xf32>
    %cst_27 = arith.constant dense<0.000000e+00> : vector<2x512xf32>
    %61 = tpu.matmul %60, %1, %cst_27 {dimension_numbers = #tpu.dot_dimension_numbers<[1], [0], [0], [1], [0, 0, 1, 1], [], []>} : vector<2x4xf32>, vector<4x512xf32>, vector<2x512xf32> -> vector<2x512xf32>
    %62 = vector.broadcast %2 : vector<1x512xf32> to vector<2x512xf32>
    %63 = arith.addf %61, %62 : vector<2x512xf32>
    %c7 = arith.constant 7 : index
    %c0_28 = arith.constant 0 : index
    %c0_29 = arith.constant 0 : index
    %64 = vector.load %arg6[%c7, %c0_28, %c0_29] : memref<8x2x512xf32, #tpu.memory_space<vmem>>, vector<1x2x512xf32>
    %65 = vector.shape_cast %64 : vector<1x2x512xf32> to vector<2x512xf32>
    %66 = vector.shape_cast %63 : vector<2x512xf32> to vector<1x2x512xf32>
    tpu.vector_store %arg6[%c7, %c0_28, %c0_29], %66 {strides = array<i32>} : memref<8x2x512xf32, #tpu.memory_space<vmem>>, vector<1x2x512xf32>,
    %cst_30 = arith.constant 0.000000e+00 : f32
    %67 = vector.broadcast %cst_30 : f32 to vector<2x128xf32>
    %cst_31 = arith.constant 0.000000e+00 : f32
    %68 = vector.broadcast %cst_31 : f32 to vector<2x128xf32>
    %c0_i32 = arith.constant 0 : i32
    %69 = arith.index_cast %c0_i32 : i32 to index
    %c0_32 = arith.constant 0 : index
    %c0_33 = arith.constant 0 : index
    %70 = vector.load %arg6[%69, %c0_32, %c0_33] : memref<8x2x512xf32, #tpu.memory_space<vmem>>, vector<1x2x512xf32>
    %71 = vector.shape_cast %70 : vector<1x2x512xf32> to vector<2x512xf32>
    %c0_34 = arith.constant 0 : index
    %c0_35 = arith.constant 0 : index
    %72 = vector.load %arg3[%c0_34, %c0_35] : memref<128x512xf32, #tpu.memory_space<vmem>>, vector<128x512xf32>
    %cst_36 = arith.constant dense<0.000000e+00> : vector<2x512xf32>
    %73 = tpu.matmul %67, %72, %cst_36 {dimension_numbers = #tpu.dot_dimension_numbers<[1], [0], [0], [1], [0, 0, 1, 1], [], []>} : vector<2x128xf32>, vector<128x512xf32>, vector<2x512xf32> -> vector<2x512xf32>
    %74 = arith.addf %71, %73 : vector<2x512xf32>
    %75 = vector.extract_strided_slice %74 {offsets = [0, 0], sizes = [2, 128], strides = [1, 1]} : vector<2x512xf32> to vector<2x128xf32>
    %76 = arith.negf %75 : vector<2x128xf32>
    %77 = math.exp %76 : vector<2x128xf32>
    %cst_37 = arith.constant 1.000000e+00 : f32
    %78 = vector.broadcast %cst_37 : f32 to vector<2x128xf32>
    %79 = arith.addf %78, %77 : vector<2x128xf32>
    %80 = arith.divf %78, %79 : vector<2x128xf32>
    %81 = vector.extract_strided_slice %74 {offsets = [0, 128], sizes = [2, 128], strides = [1, 1]} : vector<2x512xf32> to vector<2x128xf32>
    %82 = arith.negf %81 : vector<2x128xf32>
    %83 = math.exp %82 : vector<2x128xf32>
    %cst_38 = arith.constant 1.000000e+00 : f32
    %84 = vector.broadcast %cst_38 : f32 to vector<2x128xf32>
    %85 = arith.addf %84, %83 : vector<2x128xf32>
    %86 = arith.divf %84, %85 : vector<2x128xf32>
    %87 = vector.extract_strided_slice %74 {offsets = [0, 256], sizes = [2, 128], strides = [1, 1]} : vector<2x512xf32> to vector<2x128xf32>
    %88 = math.tanh %87 : vector<2x128xf32>
    %89 = vector.extract_strided_slice %74 {offsets = [0, 384], sizes = [2, 128], strides = [1, 1]} : vector<2x512xf32> to vector<2x128xf32>
    %90 = arith.negf %89 : vector<2x128xf32>
    %91 = math.exp %90 : vector<2x128xf32>
    %cst_39 = arith.constant 1.000000e+00 : f32
    %92 = vector.broadcast %cst_39 : f32 to vector<2x128xf32>
    %93 = arith.addf %92, %91 : vector<2x128xf32>
    %94 = arith.divf %92, %93 : vector<2x128xf32>
    %95 = arith.mulf %86, %68 : vector<2x128xf32>
    %96 = arith.mulf %80, %88 : vector<2x128xf32>
    %97 = arith.addf %95, %96 : vector<2x128xf32>
    %98 = math.tanh %97 : vector<2x128xf32>
    %99 = arith.mulf %94, %98 : vector<2x128xf32>
    %c1_i32 = arith.constant 1 : i32
    %100 = arith.index_cast %c1_i32 : i32 to index
    %c0_40 = arith.constant 0 : index
    %c0_41 = arith.constant 0 : index
    %101 = vector.load %arg6[%100, %c0_40, %c0_41] : memref<8x2x512xf32, #tpu.memory_space<vmem>>, vector<1x2x512xf32>
    %102 = vector.shape_cast %101 : vector<1x2x512xf32> to vector<2x512xf32>
    %c0_42 = arith.constant 0 : index
    %c0_43 = arith.constant 0 : index
    %103 = vector.load %arg3[%c0_42, %c0_43] : memref<128x512xf32, #tpu.memory_space<vmem>>, vector<128x512xf32>
    %cst_44 = arith.constant dense<0.000000e+00> : vector<2x512xf32>
    %104 = tpu.matmul %99, %103, %cst_44 {dimension_numbers = #tpu.dot_dimension_numbers<[1], [0], [0], [1], [0, 0, 1, 1], [], []>} : vector<2x128xf32>, vector<128x512xf32>, vector<2x512xf32> -> vector<2x512xf32>
    %105 = arith.addf %102, %104 : vector<2x512xf32>
    %106 = vector.extract_strided_slice %105 {offsets = [0, 0], sizes = [2, 128], strides = [1, 1]} : vector<2x512xf32> to vector<2x128xf32>
    %107 = arith.negf %106 : vector<2x128xf32>
    %108 = math.exp %107 : vector<2x128xf32>
    %cst_45 = arith.constant 1.000000e+00 : f32
    %109 = vector.broadcast %cst_45 : f32 to vector<2x128xf32>
    %110 = arith.addf %109, %108 : vector<2x128xf32>
    %111 = arith.divf %109, %110 : vector<2x128xf32>
    %112 = vector.extract_strided_slice %105 {offsets = [0, 128], sizes = [2, 128], strides = [1, 1]} : vector<2x512xf32> to vector<2x128xf32>
    %113 = arith.negf %112 : vector<2x128xf32>
    %114 = math.exp %113 : vector<2x128xf32>
    %cst_46 = arith.constant 1.000000e+00 : f32
    %115 = vector.broadcast %cst_46 : f32 to vector<2x128xf32>
    %116 = arith.addf %115, %114 : vector<2x128xf32>
    %117 = arith.divf %115, %116 : vector<2x128xf32>
    %118 = vector.extract_strided_slice %105 {offsets = [0, 256], sizes = [2, 128], strides = [1, 1]} : vector<2x512xf32> to vector<2x128xf32>
    %119 = math.tanh %118 : vector<2x128xf32>
    %120 = vector.extract_strided_slice %105 {offsets = [0, 384], sizes = [2, 128], strides = [1, 1]} : vector<2x512xf32> to vector<2x128xf32>
    %121 = arith.negf %120 : vector<2x128xf32>
    %122 = math.exp %121 : vector<2x128xf32>
    %cst_47 = arith.constant 1.000000e+00 : f32
    %123 = vector.broadcast %cst_47 : f32 to vector<2x128xf32>
    %124 = arith.addf %123, %122 : vector<2x128xf32>
    %125 = arith.divf %123, %124 : vector<2x128xf32>
    %126 = arith.mulf %117, %97 : vector<2x128xf32>
    %127 = arith.mulf %111, %119 : vector<2x128xf32>
    %128 = arith.addf %126, %127 : vector<2x128xf32>
    %129 = math.tanh %128 : vector<2x128xf32>
    %130 = arith.mulf %125, %129 : vector<2x128xf32>
    %c2_i32 = arith.constant 2 : i32
    %131 = arith.index_cast %c2_i32 : i32 to index
    %c0_48 = arith.constant 0 : index
    %c0_49 = arith.constant 0 : index
    %132 = vector.load %arg6[%131, %c0_48, %c0_49] : memref<8x2x512xf32, #tpu.memory_space<vmem>>, vector<1x2x512xf32>
    %133 = vector.shape_cast %132 : vector<1x2x512xf32> to vector<2x512xf32>
    %c0_50 = arith.constant 0 : index
    %c0_51 = arith.constant 0 : index
    %134 = vector.load %arg3[%c0_50, %c0_51] : memref<128x512xf32, #tpu.memory_space<vmem>>, vector<128x512xf32>
    %cst_52 = arith.constant dense<0.000000e+00> : vector<2x512xf32>
    %135 = tpu.matmul %130, %134, %cst_52 {dimension_numbers = #tpu.dot_dimension_numbers<[1], [0], [0], [1], [0, 0, 1, 1], [], []>} : vector<2x128xf32>, vector<128x512xf32>, vector<2x512xf32> -> vector<2x512xf32>
    %136 = arith.addf %133, %135 : vector<2x512xf32>
    %137 = vector.extract_strided_slice %136 {offsets = [0, 0], sizes = [2, 128], strides = [1, 1]} : vector<2x512xf32> to vector<2x128xf32>
    %138 = arith.negf %137 : vector<2x128xf32>
    %139 = math.exp %138 : vector<2x128xf32>
    %cst_53 = arith.constant 1.000000e+00 : f32
    %140 = vector.broadcast %cst_53 : f32 to vector<2x128xf32>
    %141 = arith.addf %140, %139 : vector<2x128xf32>
    %142 = arith.divf %140, %141 : vector<2x128xf32>
    %143 = vector.extract_strided_slice %136 {offsets = [0, 128], sizes = [2, 128], strides = [1, 1]} : vector<2x512xf32> to vector<2x128xf32>
    %144 = arith.negf %143 : vector<2x128xf32>
    %145 = math.exp %144 : vector<2x128xf32>
    %cst_54 = arith.constant 1.000000e+00 : f32
    %146 = vector.broadcast %cst_54 : f32 to vector<2x128xf32>
    %147 = arith.addf %146, %145 : vector<2x128xf32>
    %148 = arith.divf %146, %147 : vector<2x128xf32>
    %149 = vector.extract_strided_slice %136 {offsets = [0, 256], sizes = [2, 128], strides = [1, 1]} : vector<2x512xf32> to vector<2x128xf32>
    %150 = math.tanh %149 : vector<2x128xf32>
    %151 = vector.extract_strided_slice %136 {offsets = [0, 384], sizes = [2, 128], strides = [1, 1]} : vector<2x512xf32> to vector<2x128xf32>
    %152 = arith.negf %151 : vector<2x128xf32>
    %153 = math.exp %152 : vector<2x128xf32>
    %cst_55 = arith.constant 1.000000e+00 : f32
    %154 = vector.broadcast %cst_55 : f32 to vector<2x128xf32>
    %155 = arith.addf %154, %153 : vector<2x128xf32>
    %156 = arith.divf %154, %155 : vector<2x128xf32>
    %157 = arith.mulf %148, %128 : vector<2x128xf32>
    %158 = arith.mulf %142, %150 : vector<2x128xf32>
    %159 = arith.addf %157, %158 : vector<2x128xf32>
    %160 = math.tanh %159 : vector<2x128xf32>
    %161 = arith.mulf %156, %160 : vector<2x128xf32>
    %c3_i32 = arith.constant 3 : i32
    %162 = arith.index_cast %c3_i32 : i32 to index
    %c0_56 = arith.constant 0 : index
    %c0_57 = arith.constant 0 : index
    %163 = vector.load %arg6[%162, %c0_56, %c0_57] : memref<8x2x512xf32, #tpu.memory_space<vmem>>, vector<1x2x512xf32>
    %164 = vector.shape_cast %163 : vector<1x2x512xf32> to vector<2x512xf32>
    %c0_58 = arith.constant 0 : index
    %c0_59 = arith.constant 0 : index
    %165 = vector.load %arg3[%c0_58, %c0_59] : memref<128x512xf32, #tpu.memory_space<vmem>>, vector<128x512xf32>
    %cst_60 = arith.constant dense<0.000000e+00> : vector<2x512xf32>
    %166 = tpu.matmul %161, %165, %cst_60 {dimension_numbers = #tpu.dot_dimension_numbers<[1], [0], [0], [1], [0, 0, 1, 1], [], []>} : vector<2x128xf32>, vector<128x512xf32>, vector<2x512xf32> -> vector<2x512xf32>
    %167 = arith.addf %164, %166 : vector<2x512xf32>
    %168 = vector.extract_strided_slice %167 {offsets = [0, 0], sizes = [2, 128], strides = [1, 1]} : vector<2x512xf32> to vector<2x128xf32>
    %169 = arith.negf %168 : vector<2x128xf32>
    %170 = math.exp %169 : vector<2x128xf32>
    %cst_61 = arith.constant 1.000000e+00 : f32
    %171 = vector.broadcast %cst_61 : f32 to vector<2x128xf32>
    %172 = arith.addf %171, %170 : vector<2x128xf32>
    %173 = arith.divf %171, %172 : vector<2x128xf32>
    %174 = vector.extract_strided_slice %167 {offsets = [0, 128], sizes = [2, 128], strides = [1, 1]} : vector<2x512xf32> to vector<2x128xf32>
    %175 = arith.negf %174 : vector<2x128xf32>
    %176 = math.exp %175 : vector<2x128xf32>
    %cst_62 = arith.constant 1.000000e+00 : f32
    %177 = vector.broadcast %cst_62 : f32 to vector<2x128xf32>
    %178 = arith.addf %177, %176 : vector<2x128xf32>
    %179 = arith.divf %177, %178 : vector<2x128xf32>
    %180 = vector.extract_strided_slice %167 {offsets = [0, 256], sizes = [2, 128], strides = [1, 1]} : vector<2x512xf32> to vector<2x128xf32>
    %181 = math.tanh %180 : vector<2x128xf32>
    %182 = vector.extract_strided_slice %167 {offsets = [0, 384], sizes = [2, 128], strides = [1, 1]} : vector<2x512xf32> to vector<2x128xf32>
    %183 = arith.negf %182 : vector<2x128xf32>
    %184 = math.exp %183 : vector<2x128xf32>
    %cst_63 = arith.constant 1.000000e+00 : f32
    %185 = vector.broadcast %cst_63 : f32 to vector<2x128xf32>
    %186 = arith.addf %185, %184 : vector<2x128xf32>
    %187 = arith.divf %185, %186 : vector<2x128xf32>
    %188 = arith.mulf %179, %159 : vector<2x128xf32>
    %189 = arith.mulf %173, %181 : vector<2x128xf32>
    %190 = arith.addf %188, %189 : vector<2x128xf32>
    %191 = math.tanh %190 : vector<2x128xf32>
    %192 = arith.mulf %187, %191 : vector<2x128xf32>
    %c4_i32 = arith.constant 4 : i32
    %193 = arith.index_cast %c4_i32 : i32 to index
    %c0_64 = arith.constant 0 : index
    %c0_65 = arith.constant 0 : index
    %194 = vector.load %arg6[%193, %c0_64, %c0_65] : memref<8x2x512xf32, #tpu.memory_space<vmem>>, vector<1x2x512xf32>
    %195 = vector.shape_cast %194 : vector<1x2x512xf32> to vector<2x512xf32>
    %c0_66 = arith.constant 0 : index
    %c0_67 = arith.constant 0 : index
    %196 = vector.load %arg3[%c0_66, %c0_67] : memref<128x512xf32, #tpu.memory_space<vmem>>, vector<128x512xf32>
    %cst_68 = arith.constant dense<0.000000e+00> : vector<2x512xf32>
    %197 = tpu.matmul %192, %196, %cst_68 {dimension_numbers = #tpu.dot_dimension_numbers<[1], [0], [0], [1], [0, 0, 1, 1], [], []>} : vector<2x128xf32>, vector<128x512xf32>, vector<2x512xf32> -> vector<2x512xf32>
    %198 = arith.addf %195, %197 : vector<2x512xf32>
    %199 = vector.extract_strided_slice %198 {offsets = [0, 0], sizes = [2, 128], strides = [1, 1]} : vector<2x512xf32> to vector<2x128xf32>
    %200 = arith.negf %199 : vector<2x128xf32>
    %201 = math.exp %200 : vector<2x128xf32>
    %cst_69 = arith.constant 1.000000e+00 : f32
    %202 = vector.broadcast %cst_69 : f32 to vector<2x128xf32>
    %203 = arith.addf %202, %201 : vector<2x128xf32>
    %204 = arith.divf %202, %203 : vector<2x128xf32>
    %205 = vector.extract_strided_slice %198 {offsets = [0, 128], sizes = [2, 128], strides = [1, 1]} : vector<2x512xf32> to vector<2x128xf32>
    %206 = arith.negf %205 : vector<2x128xf32>
    %207 = math.exp %206 : vector<2x128xf32>
    %cst_70 = arith.constant 1.000000e+00 : f32
    %208 = vector.broadcast %cst_70 : f32 to vector<2x128xf32>
    %209 = arith.addf %208, %207 : vector<2x128xf32>
    %210 = arith.divf %208, %209 : vector<2x128xf32>
    %211 = vector.extract_strided_slice %198 {offsets = [0, 256], sizes = [2, 128], strides = [1, 1]} : vector<2x512xf32> to vector<2x128xf32>
    %212 = math.tanh %211 : vector<2x128xf32>
    %213 = vector.extract_strided_slice %198 {offsets = [0, 384], sizes = [2, 128], strides = [1, 1]} : vector<2x512xf32> to vector<2x128xf32>
    %214 = arith.negf %213 : vector<2x128xf32>
    %215 = math.exp %214 : vector<2x128xf32>
    %cst_71 = arith.constant 1.000000e+00 : f32
    %216 = vector.broadcast %cst_71 : f32 to vector<2x128xf32>
    %217 = arith.addf %216, %215 : vector<2x128xf32>
    %218 = arith.divf %216, %217 : vector<2x128xf32>
    %219 = arith.mulf %210, %190 : vector<2x128xf32>
    %220 = arith.mulf %204, %212 : vector<2x128xf32>
    %221 = arith.addf %219, %220 : vector<2x128xf32>
    %222 = math.tanh %221 : vector<2x128xf32>
    %223 = arith.mulf %218, %222 : vector<2x128xf32>
    %c5_i32 = arith.constant 5 : i32
    %224 = arith.index_cast %c5_i32 : i32 to index
    %c0_72 = arith.constant 0 : index
    %c0_73 = arith.constant 0 : index
    %225 = vector.load %arg6[%224, %c0_72, %c0_73] : memref<8x2x512xf32, #tpu.memory_space<vmem>>, vector<1x2x512xf32>
    %226 = vector.shape_cast %225 : vector<1x2x512xf32> to vector<2x512xf32>
    %c0_74 = arith.constant 0 : index
    %c0_75 = arith.constant 0 : index
    %227 = vector.load %arg3[%c0_74, %c0_75] : memref<128x512xf32, #tpu.memory_space<vmem>>, vector<128x512xf32>
    %cst_76 = arith.constant dense<0.000000e+00> : vector<2x512xf32>
    %228 = tpu.matmul %223, %227, %cst_76 {dimension_numbers = #tpu.dot_dimension_numbers<[1], [0], [0], [1], [0, 0, 1, 1], [], []>} : vector<2x128xf32>, vector<128x512xf32>, vector<2x512xf32> -> vector<2x512xf32>
    %229 = arith.addf %226, %228 : vector<2x512xf32>
    %230 = vector.extract_strided_slice %229 {offsets = [0, 0], sizes = [2, 128], strides = [1, 1]} : vector<2x512xf32> to vector<2x128xf32>
    %231 = arith.negf %230 : vector<2x128xf32>
    %232 = math.exp %231 : vector<2x128xf32>
    %cst_77 = arith.constant 1.000000e+00 : f32
    %233 = vector.broadcast %cst_77 : f32 to vector<2x128xf32>
    %234 = arith.addf %233, %232 : vector<2x128xf32>
    %235 = arith.divf %233, %234 : vector<2x128xf32>
    %236 = vector.extract_strided_slice %229 {offsets = [0, 128], sizes = [2, 128], strides = [1, 1]} : vector<2x512xf32> to vector<2x128xf32>
    %237 = arith.negf %236 : vector<2x128xf32>
    %238 = math.exp %237 : vector<2x128xf32>
    %cst_78 = arith.constant 1.000000e+00 : f32
    %239 = vector.broadcast %cst_78 : f32 to vector<2x128xf32>
    %240 = arith.addf %239, %238 : vector<2x128xf32>
    %241 = arith.divf %239, %240 : vector<2x128xf32>
    %242 = vector.extract_strided_slice %229 {offsets = [0, 256], sizes = [2, 128], strides = [1, 1]} : vector<2x512xf32> to vector<2x128xf32>
    %243 = math.tanh %242 : vector<2x128xf32>
    %244 = vector.extract_strided_slice %229 {offsets = [0, 384], sizes = [2, 128], strides = [1, 1]} : vector<2x512xf32> to vector<2x128xf32>
    %245 = arith.negf %244 : vector<2x128xf32>
    %246 = math.exp %245 : vector<2x128xf32>
    %cst_79 = arith.constant 1.000000e+00 : f32
    %247 = vector.broadcast %cst_79 : f32 to vector<2x128xf32>
    %248 = arith.addf %247, %246 : vector<2x128xf32>
    %249 = arith.divf %247, %248 : vector<2x128xf32>
    %250 = arith.mulf %241, %221 : vector<2x128xf32>
    %251 = arith.mulf %235, %243 : vector<2x128xf32>
    %252 = arith.addf %250, %251 : vector<2x128xf32>
    %253 = math.tanh %252 : vector<2x128xf32>
    %254 = arith.mulf %249, %253 : vector<2x128xf32>
    %c6_i32 = arith.constant 6 : i32
    %255 = arith.index_cast %c6_i32 : i32 to index
    %c0_80 = arith.constant 0 : index
    %c0_81 = arith.constant 0 : index
    %256 = vector.load %arg6[%255, %c0_80, %c0_81] : memref<8x2x512xf32, #tpu.memory_space<vmem>>, vector<1x2x512xf32>
    %257 = vector.shape_cast %256 : vector<1x2x512xf32> to vector<2x512xf32>
    %c0_82 = arith.constant 0 : index
    %c0_83 = arith.constant 0 : index
    %258 = vector.load %arg3[%c0_82, %c0_83] : memref<128x512xf32, #tpu.memory_space<vmem>>, vector<128x512xf32>
    %cst_84 = arith.constant dense<0.000000e+00> : vector<2x512xf32>
    %259 = tpu.matmul %254, %258, %cst_84 {dimension_numbers = #tpu.dot_dimension_numbers<[1], [0], [0], [1], [0, 0, 1, 1], [], []>} : vector<2x128xf32>, vector<128x512xf32>, vector<2x512xf32> -> vector<2x512xf32>
    %260 = arith.addf %257, %259 : vector<2x512xf32>
    %261 = vector.extract_strided_slice %260 {offsets = [0, 0], sizes = [2, 128], strides = [1, 1]} : vector<2x512xf32> to vector<2x128xf32>
    %262 = arith.negf %261 : vector<2x128xf32>
    %263 = math.exp %262 : vector<2x128xf32>
    %cst_85 = arith.constant 1.000000e+00 : f32
    %264 = vector.broadcast %cst_85 : f32 to vector<2x128xf32>
    %265 = arith.addf %264, %263 : vector<2x128xf32>
    %266 = arith.divf %264, %265 : vector<2x128xf32>
    %267 = vector.extract_strided_slice %260 {offsets = [0, 128], sizes = [2, 128], strides = [1, 1]} : vector<2x512xf32> to vector<2x128xf32>
    %268 = arith.negf %267 : vector<2x128xf32>
    %269 = math.exp %268 : vector<2x128xf32>
    %cst_86 = arith.constant 1.000000e+00 : f32
    %270 = vector.broadcast %cst_86 : f32 to vector<2x128xf32>
    %271 = arith.addf %270, %269 : vector<2x128xf32>
    %272 = arith.divf %270, %271 : vector<2x128xf32>
    %273 = vector.extract_strided_slice %260 {offsets = [0, 256], sizes = [2, 128], strides = [1, 1]} : vector<2x512xf32> to vector<2x128xf32>
    %274 = math.tanh %273 : vector<2x128xf32>
    %275 = vector.extract_strided_slice %260 {offsets = [0, 384], sizes = [2, 128], strides = [1, 1]} : vector<2x512xf32> to vector<2x128xf32>
    %276 = arith.negf %275 : vector<2x128xf32>
    %277 = math.exp %276 : vector<2x128xf32>
    %cst_87 = arith.constant 1.000000e+00 : f32
    %278 = vector.broadcast %cst_87 : f32 to vector<2x128xf32>
    %279 = arith.addf %278, %277 : vector<2x128xf32>
    %280 = arith.divf %278, %279 : vector<2x128xf32>
    %281 = arith.mulf %272, %252 : vector<2x128xf32>
    %282 = arith.mulf %266, %274 : vector<2x128xf32>
    %283 = arith.addf %281, %282 : vector<2x128xf32>
    %284 = math.tanh %283 : vector<2x128xf32>
    %285 = arith.mulf %280, %284 : vector<2x128xf32>
    %c7_i32 = arith.constant 7 : i32
    %286 = arith.index_cast %c7_i32 : i32 to index
    %c0_88 = arith.constant 0 : index
    %c0_89 = arith.constant 0 : index
    %287 = vector.load %arg6[%286, %c0_88, %c0_89] : memref<8x2x512xf32, #tpu.memory_space<vmem>>, vector<1x2x512xf32>
    %288 = vector.shape_cast %287 : vector<1x2x512xf32> to vector<2x512xf32>
    %c0_90 = arith.constant 0 : index
    %c0_91 = arith.constant 0 : index
    %289 = vector.load %arg3[%c0_90, %c0_91] : memref<128x512xf32, #tpu.memory_space<vmem>>, vector<128x512xf32>
    %cst_92 = arith.constant dense<0.000000e+00> : vector<2x512xf32>
    %290 = tpu.matmul %285, %289, %cst_92 {dimension_numbers = #tpu.dot_dimension_numbers<[1], [0], [0], [1], [0, 0, 1, 1], [], []>} : vector<2x128xf32>, vector<128x512xf32>, vector<2x512xf32> -> vector<2x512xf32>
    %291 = arith.addf %288, %290 : vector<2x512xf32>
    %292 = vector.extract_strided_slice %291 {offsets = [0, 0], sizes = [2, 128], strides = [1, 1]} : vector<2x512xf32> to vector<2x128xf32>
    %293 = arith.negf %292 : vector<2x128xf32>
    %294 = math.exp %293 : vector<2x128xf32>
    %cst_93 = arith.constant 1.000000e+00 : f32
    %295 = vector.broadcast %cst_93 : f32 to vector<2x128xf32>
    %296 = arith.addf %295, %294 : vector<2x128xf32>
    %297 = arith.divf %295, %296 : vector<2x128xf32>
    %298 = vector.extract_strided_slice %291 {offsets = [0, 128], sizes = [2, 128], strides = [1, 1]} : vector<2x512xf32> to vector<2x128xf32>
    %299 = arith.negf %298 : vector<2x128xf32>
    %300 = math.exp %299 : vector<2x128xf32>
    %cst_94 = arith.constant 1.000000e+00 : f32
    %301 = vector.broadcast %cst_94 : f32 to vector<2x128xf32>
    %302 = arith.addf %301, %300 : vector<2x128xf32>
    %303 = arith.divf %301, %302 : vector<2x128xf32>
    %304 = vector.extract_strided_slice %291 {offsets = [0, 256], sizes = [2, 128], strides = [1, 1]} : vector<2x512xf32> to vector<2x128xf32>
    %305 = math.tanh %304 : vector<2x128xf32>
    %306 = vector.extract_strided_slice %291 {offsets = [0, 384], sizes = [2, 128], strides = [1, 1]} : vector<2x512xf32> to vector<2x128xf32>
    %307 = arith.negf %306 : vector<2x128xf32>
    %308 = math.exp %307 : vector<2x128xf32>
    %cst_95 = arith.constant 1.000000e+00 : f32
    %309 = vector.broadcast %cst_95 : f32 to vector<2x128xf32>
    %310 = arith.addf %309, %308 : vector<2x128xf32>
    %311 = arith.divf %309, %310 : vector<2x128xf32>
    %312 = arith.mulf %303, %283 : vector<2x128xf32>
    %313 = arith.mulf %297, %305 : vector<2x128xf32>
    %314 = arith.addf %312, %313 : vector<2x128xf32>
    %315 = math.tanh %314 : vector<2x128xf32>
    %316 = arith.mulf %311, %315 : vector<2x128xf32>
    %c8_i32 = arith.constant 8 : i32
    %317 = vector.extract_strided_slice %316 {offsets = [0, 0], sizes = [2, 64], strides = [1, 1]} : vector<2x128xf32> to vector<2x64xf32>
    %c0_96 = arith.constant 0 : index
    %c0_97 = arith.constant 0 : index
    %318 = vector.load %arg5[%c0_96, %c0_97] : memref<2x64xf32, #tpu.memory_space<vmem>>, vector<2x64xf32>
    tpu.vector_store %arg5[%c0_96, %c0_97], %317 {strides = array<i32>} : memref<2x64xf32, #tpu.memory_space<vmem>>, vector<2x64xf32>,
    return
  }
  func.func @transform_0(%arg0: i32) -> (i32, i32, i32) {
    %c0_i32 = arith.constant 0 : i32
    %c0_i32_0 = arith.constant 0 : i32
    %c0_i32_1 = arith.constant 0 : i32
    %c0_i32_2 = arith.constant 0 : i32
    return %c0_i32, %c0_i32_0, %c0_i32_1 : i32, i32, i32
  }
  func.func @transform_1(%arg0: i32) -> (i32, i32) {
    %c0_i32 = arith.constant 0 : i32
    %c0_i32_0 = arith.constant 0 : i32
    %c0_i32_1 = arith.constant 0 : i32
    return %c0_i32, %c0_i32_0 : i32, i32
  }
  func.func @transform_2(%arg0: i32) -> (i32, i32) {
    %c0_i32 = arith.constant 0 : i32
    %c0_i32_0 = arith.constant 0 : i32
    %c0_i32_1 = arith.constant 0 : i32
    return %c0_i32, %c0_i32_0 : i32, i32
  }
  func.func @transform_3(%arg0: i32) -> (i32, i32) {
    %c0_i32 = arith.constant 0 : i32
    %c0_i32_0 = arith.constant 0 : i32
    %c0_i32_1 = arith.constant 0 : i32
    return %c0_i32, %c0_i32_0 : i32, i32
  }
  func.func @transform_4(%arg0: i32) -> (i32, i32) {
    %c0_i32 = arith.constant 0 : i32
    %c0_i32_0 = arith.constant 0 : i32
    %c0_i32_1 = arith.constant 0 : i32
    return %c0_i32, %c0_i32_0 : i32, i32
  }
}

</mosaic_0001>

<bundles_post_ra>
// kernel: tpu_custom_call.1
= control target key start
LH: loop header
LB: loop body
LE: loop exit
PB: predicated region body
PF: predicated region fallthrough
CT: control target
= control target key end

     0   :  { %9 = vsyncpa [#allocation4], 0  ;;  %s4560_s0 = inlined_call_operand.vmem [shape: f32[2,8,4], index: 0, kind: input, shape index: {}]   ;;  %s4561_s1 = inlined_call_operand.vmem [shape: f32[4,512], index: 1, kind: input, shape index: {}]   ;;  %s4562_s2 = inlined_call_operand.hbm [shape: f32[128,512], index: 2, kind: input, shape index: {}]   ;;  %s4563_s3 = inlined_call_operand.vmem [shape: f32[1,512], index: 3, kind: input, shape index: {}]   ;;  %s4564_s4 = inlined_call_operand.hbm [shape: f32[2,64], index: 4, kind: output, shape index: {}]  }
   0x1   :  { %10 = vsyncpa [#allocation5], 0  ;;  %s3413_s15 = smov [#allocation3]  }
   0x2   :  { %s20_s16 = sshll.u32 %s3413_s15, 4  ;;  %s21_s16 = int_to_ptr.vmem [resolvable:$true] %s20_s16 }
   0x3   :  { %s3377_s17 = scalar_lea.vmem %s21_s16, 8192  ;;  %p3382_p1 = scmp.lt.s32.totalorder %s21_s16, %s21_s16 }
   0x4   :  { %p3378_p0 = scmp.ne.s32.totalorder %s21_s16, %s3377_s17  ;;  %p3383_p2 = scmp.lt.s32.totalorder %s3377_s17, %s3377_s17 }
   0x6   :  { %p3384_p3 = por %p3383_p2, %p3382_p1 }
   0x8   :  { %p3385_p4 = pnand %p3384_p3, %p3378_p0 }
   0xa   :  { %3388 = shalt.err (!%p3385_p4)
}
   0xb   :  { %s3414_s18 = smov 512   ;;  %s3415_s19 = smov 32  }
   0xc   :  { %26 = dma.hbm_to_vmem [thread:$0]  %s4562_s2, 8192, %s21_s16, [#allocation4], %s3414_s18, %s3414_s18, %s3415_s19  }
   0xd   :  { %3409 = dma.done.wait [#allocation4], 8192  }
   0xe   :  { %3410 = vsyncadd [#allocation4], 4294959104  ;;  %v4565_v0 = vmov 0.0   ;;  %v3452_v1 = vld [vmem:[%s4561_s1] sm:$0xff]  ;;  %vm70_vm0 = vcmask 1043456   ;;  %v3457_v2 = vld [vmem:[%s4561_s1 + $0x8] sm:$0xff] }
   0xf   :  { %143 = vmatprep.mubr.f32.mxu0 %v4565_v0  ;;  %214 = vmatprep.mubr.f32.mxu1 %v4565_v0  ;;  %v3461_v3 = vcombine.high %v3452_v1, %v3452_v1  ;;  %v3465_v4 = vcombine.high %v3457_v2, %v3457_v2  ;;  %v3470_v5 = vld [vmem:[%s4560_s0] sm:$0xff]  ;;  %v3475_v6 = vld [vmem:[%s4560_s0 + $0x8] sm:$0xff]  ;;  %vm61_vm1 = vcmask 1041409   ;;  %vm67_vm2 = vcmask 31744   ;;  %v3588_v29 = vld [vmem:[#allocation3 + $0x1f8] sm:$0xff] }
  0x10   :  { %v60_v7 = vrot.slane %v3475_v6, 7  ;;  %v244_v8 = vrot.slane %v3470_v5, 1  ;;  %v414_v11 = vrot.slane %v3470_v5, 2  ;;  %v415_v12 = vrot.slane %v3475_v6, 1  ;;  %v3586_v28 = vld [vmem:[#allocation3 + $0x1e8] sm:$0xff]  ;;  %4687 = vst [vmem:[#allocation10_spill] sm:$0xff] %v3588_v29 }
  0x11   :  { %3097 = vmatprep.subr.msk.mxu0 %vm70_vm0, %v3461_v3  ;;  %3100 = vmatprep.subr.msk.mxu1 %vm70_vm0, %v3465_v4  ;;  %v585_v14 = vrot.slane %v3470_v5, 3  ;;  %v586_v15 = vrot.slane %v3475_v6, 2  ;;  %v756_v17 = vrot.slane %v3470_v5, 4  ;;  %v757_v18 = vrot.slane %v3475_v6, 3  ;;  %4686 = vst [vmem:[#allocation9_spill] sm:$0xff] %v3586_v28  ;;  %v3597_v31 = vld [vmem:[#allocation3 + $0x1e0] sm:$0xff] }
  0x12   :  { %3098 = vmatpush1.msk.msra.mxu0 %vm70_vm0, %v3452_v1  ;;  %3101 = vmatpush1.msk.msra.mxu1 %vm70_vm0, %v3457_v2  ;;  %v62_v9 = vsel %vm61_vm1, %v60_v7, %v3470_v5  ;;  %v245_v10 = vsel %vm61_vm1, %v3475_v6, %v244_v8  ;;  %v416_v13 = vsel %vm61_vm1, %v415_v12, %v414_v11  ;;  %v927_v20 = vrot.slane %v3470_v5, 5  ;;  %v3599_v32 = vld [vmem:[#allocation3 + $0x1f0] sm:$0xff]  ;;  %v3603_v33 = vld [vmem:[#allocation3 + $0x1c8] sm:$0xff]  ;;  %v3605_v34 = vld [vmem:[#allocation3 + $0x1d8] sm:$0xff] }
  0x13   :  { %3099 = vmatmul.mubr.msk.f32.vlgmr.msra.gmra.mxu0 %vm67_vm2, %v62_v9  ;;  %3102 = vmatmul.mubr.msk.f32.vlgmr.msra.gmra.mxu1 %vm67_vm2, %v62_v9  ;;  %v587_v16 = vsel %vm61_vm1, %v586_v15, %v585_v14  ;;  %v758_v19 = vsel %vm61_vm1, %v757_v18, %v756_v17  ;;  %v928_v21 = vrot.slane %v3475_v6, 4  ;;  %v1098_v23 = vrot.slane %v3470_v5, 6  ;;  %v3609_v35 = vld [vmem:[#allocation3 + $0x1c0] sm:$0xff]  ;;  %v3611_v36 = vld [vmem:[#allocation3 + $0x1d0] sm:$0xff]  ;;  %v3615_v37 = vld [vmem:[#allocation3 + $0x1a8] sm:$0xff] }
  0x14   :  { %3103 = vmatprep.subr.msk.mxu0 %vm70_vm0, %v3461_v3  ;;  %3106 = vmatprep.subr.msk.mxu1 %vm70_vm0, %v3465_v4  ;;  %v1099_v24 = vrot.slane %v3475_v6, 5  ;;  %v1269_v26 = vrot.slane %v3470_v5, 7  ;;  %v1270_v27 = vrot.slane %v3475_v6, 6  ;;  %v3617_v38 = vld [vmem:[#allocation3 + $0x1b8] sm:$0xff]  ;;  %v3621_v39 = vld [vmem:[#allocation3 + $0x1a0] sm:$0xff]  ;;  %v3623_v40 = vld [vmem:[#allocation3 + $0x1b0] sm:$0xff] }
  0x15   :  { %3104 = vmatpush1.msk.msra.mxu0 %vm70_vm0, %v3452_v1  ;;  %3107 = vmatpush1.msk.msra.mxu1 %vm70_vm0, %v3457_v2  ;;  %v929_v22 = vsel %vm61_vm1, %v928_v21, %v927_v20  ;;  %v3627_v41 = vld [vmem:[#allocation3 + $0x188] sm:$0xff]  ;;  %v3629_v42 = vld [vmem:[#allocation3 + $0x198] sm:$0xff]  ;;  %v3633_v43 = vld [vmem:[#allocation3 + $0x180] sm:$0xff]  ;;  %vm3080_vm3 = vcmask 517120  }
  0x16   :  { %312 = vmatprep.mubr.f32.mxu0 %v4565_v0  ;;  %383 = vmatprep.mubr.f32.mxu1 %v4565_v0  ;;  %v1100_v25 = vsel %vm61_vm1, %v1099_v24, %v1098_v23  ;;  %v1271_v30 = vsel %vm61_vm1, %v1270_v27, %v1269_v26  ;;  %v3635_v44 = vld [vmem:[#allocation3 + $0x190] sm:$0xff]  ;;  %v3639_v45 = vld [vmem:[#allocation3 + $0x168] sm:$0xff]  ;;  %v3641_v46 = vld [vmem:[#allocation3 + $0x178] sm:$0xff] }
  0x17   :  { %3105 = vmatmul.mubr.msk.f32.vlgmr.msra.gmra.mxu0 %vm67_vm2, %v245_v10  ;;  %3108 = vmatmul.mubr.msk.f32.vlgmr.msra.gmra.mxu1 %vm67_vm2, %v245_v10  ;;  %v3645_v47 = vld [vmem:[#allocation3 + $0x160] sm:$0xff]  ;;  %v3647_v48 = vld [vmem:[#allocation3 + $0x170] sm:$0xff]  ;;  %v3651_v49 = vld [vmem:[#allocation3 + $0x148] sm:$0xff] }
  0x18   :  { %3109 = vmatprep.subr.msk.mxu0 %vm70_vm0, %v3461_v3  ;;  %3112 = vmatprep.subr.msk.mxu1 %vm70_vm0, %v3465_v4  ;;  %v3653_v50 = vld [vmem:[#allocation3 + $0x158] sm:$0xff]  ;;  %v3657_v51 = vld [vmem:[#allocation3 + $0x140] sm:$0xff]  ;;  %v3659_v52 = vld [vmem:[#allocation3 + $0x150] sm:$0xff] }
  0x19   :  { %3110 = vmatpush1.msk.msra.mxu0 %vm70_vm0, %v3452_v1  ;;  %3113 = vmatpush1.msk.msra.mxu1 %vm70_vm0, %v3457_v2  ;;  %v3663_v53 = vld [vmem:[#allocation3 + $0x128] sm:$0xff]  ;;  %v3665_v54 = vld [vmem:[#allocation3 + $0x138] sm:$0xff]  ;;  %v3669_v55 = vld [vmem:[#allocation3 + $0x120] sm:$0xff] }
  0x1a   :  { %483 = vmatprep.mubr.f32.mxu0 %v4565_v0  ;;  %554 = vmatprep.mubr.f32.mxu1 %v4565_v0  ;;  %v3671_v56 = vld [vmem:[#allocation3 + $0x130] sm:$0xff]  ;;  %v3675_v57 = vld [vmem:[#allocation3 + $0x108] sm:$0xff]  ;;  %v3677_v58 = vld [vmem:[#allocation3 + $0x118] sm:$0xff] }
  0x1b   :  { %3111 = vmatmul.mubr.msk.f32.vlgmr.msra.gmra.mxu0 %vm67_vm2, %v416_v13  ;;  %3114 = vmatmul.mubr.msk.f32.vlgmr.msra.gmra.mxu1 %vm67_vm2, %v416_v13  ;;  %v3681_v59 = vld [vmem:[#allocation3 + $0x100] sm:$0xff]  ;;  %v3683_v60 = vld [vmem:[#allocation3 + $0x110] sm:$0xff]  ;;  %v3687_v61 = vld [vmem:[#allocation3 + $0xe8] sm:$0xff] }
  0x1c   :  { %3115 = vmatprep.subr.msk.mxu0 %vm70_vm0, %v3461_v3  ;;  %3118 = vmatprep.subr.msk.mxu1 %vm70_vm0, %v3465_v4  ;;  %v3689_v62 = vld [vmem:[#allocation3 + $0xf8] sm:$0xff]  ;;  %v3693_v63 = vld [vmem:[#allocation3 + $0xe0] sm:$0xff]  ;;  %v3707_v5 = vld [vmem:[#allocation3 + $0xd0] sm:$0xff] }
  0x1d   :  { %3116 = vmatpush1.msk.msra.mxu0 %vm70_vm0, %v3452_v1  ;;  %3119 = vmatpush1.msk.msra.mxu1 %vm70_vm0, %v3457_v2  ;;  %4690 = vst [vmem:[#allocation13_spill] sm:$0xff] %v3707_v5  ;;  %v3711_v6 = vld [vmem:[#allocation3 + $0xa8] sm:$0xff]  ;;  %v3713_v7 = vld [vmem:[#allocation3 + $0xb8] sm:$0xff]  ;;  %v3717_v8 = vld [vmem:[#allocation3 + $0xa0] sm:$0xff] }
  0x1e   :  { %654 = vmatprep.mubr.f32.mxu0 %v4565_v0  ;;  %725 = vmatprep.mubr.f32.mxu1 %v4565_v0  ;;  %4691 = vst [vmem:[#allocation14_spill] sm:$0xff] %v3711_v6  ;;  %4692 = vst [vmem:[#allocation15_spill] sm:$0xff] %v3713_v7  ;;  %v3719_v9 = vld [vmem:[#allocation3 + $0xb0] sm:$0xff]  ;;  %v3723_v10 = vld [vmem:[#allocation3 + $0x88] sm:$0xff] }
  0x1f   :  { %3117 = vmatmul.mubr.msk.f32.vlgmr.msra.gmra.mxu0 %vm67_vm2, %v587_v16  ;;  %3120 = vmatmul.mubr.msk.f32.vlgmr.msra.gmra.mxu1 %vm67_vm2, %v587_v16  ;;  %4693 = vst [vmem:[#allocation16_spill] sm:$0xff] %v3717_v8  ;;  %4694 = vst [vmem:[#allocation17_spill] sm:$0xff] %v3719_v9  ;;  %v3725_v11 = vld [vmem:[#allocation3 + $0x98] sm:$0xff]  ;;  %v3729_v12 = vld [vmem:[#allocation3 + $0x80] sm:$0xff] }
  0x20   :  { %3121 = vmatprep.subr.msk.mxu0 %vm70_vm0, %v3461_v3  ;;  %3124 = vmatprep.subr.msk.mxu1 %vm70_vm0, %v3465_v4  ;;  %4695 = vst [vmem:[#allocation18_spill] sm:$0xff] %v3723_v10  ;;  %4696 = vst [vmem:[#allocation19_spill] sm:$0xff] %v3725_v11  ;;  %v3731_v13 = vld [vmem:[#allocation3 + $0x90] sm:$0xff]  ;;  %v3735_v14 = vld [vmem:[#allocation3 + $0x68] sm:$0xff] }
  0x21   :  { %3122 = vmatpush1.msk.msra.mxu0 %vm70_vm0, %v3452_v1  ;;  %3125 = vmatpush1.msk.msra.mxu1 %vm70_vm0, %v3457_v2  ;;  %4697 = vst [vmem:[#allocation20_spill] sm:$0xff] %v3729_v12  ;;  %4698 = vst [vmem:[#allocation21_spill] sm:$0xff] %v3731_v13  ;;  %v3737_v15 = vld [vmem:[#allocation3 + $0x78] sm:$0xff]  ;;  %v3741_v16 = vld [vmem:[#allocation3 + $0x60] sm:$0xff] }
  0x22   :  { %825 = vmatprep.mubr.f32.mxu0 %v4565_v0  ;;  %896 = vmatprep.mubr.f32.mxu1 %v4565_v0  ;;  %4699 = vst [vmem:[#allocation22_spill] sm:$0xff] %v3735_v14  ;;  %4700 = vst [vmem:[#allocation23_spill] sm:$0xff] %v3737_v15  ;;  %v3743_v17 = vld [vmem:[#allocation3 + $0x70] sm:$0xff]  ;;  %v3747_v18 = vld [vmem:[#allocation3 + $0x48] sm:$0xff] }
  0x23   :  { %3123 = vmatmul.mubr.msk.f32.vlgmr.msra.gmra.mxu0 %vm67_vm2, %v758_v19  ;;  %3126 = vmatmul.mubr.msk.f32.vlgmr.msra.gmra.mxu1 %vm67_vm2, %v758_v19  ;;  %4701 = vst [vmem:[#allocation24_spill] sm:$0xff] %v3741_v16  ;;  %4702 = vst [vmem:[#allocation25_spill] sm:$0xff] %v3743_v17  ;;  %v3749_v19 = vld [vmem:[#allocation3 + $0x58] sm:$0xff]  ;;  %v3753_v20 = vld [vmem:[#allocation3 + $0x40] sm:$0xff] }
  0x24   :  { %3127 = vmatprep.subr.msk.mxu0 %vm70_vm0, %v3461_v3  ;;  %3130 = vmatprep.subr.msk.mxu1 %vm70_vm0, %v3465_v4  ;;  %4703 = vst [vmem:[#allocation26_spill] sm:$0xff] %v3747_v18  ;;  %4704 = vst [vmem:[#allocation27_spill] sm:$0xff] %v3749_v19  ;;  %v3755_v21 = vld [vmem:[#allocation3 + $0x50] sm:$0xff]  ;;  %v3761_v23 = vld [vmem:[#allocation3 + $0x38] sm:$0xff] }
  0x25   :  { %3128 = vmatpush1.msk.msra.mxu0 %vm70_vm0, %v3452_v1  ;;  %3131 = vmatpush1.msk.msra.mxu1 %vm70_vm0, %v3457_v2  ;;  %4705 = vst [vmem:[#allocation28_spill] sm:$0xff] %v3753_v20  ;;  %4706 = vst [vmem:[#allocation29_spill] sm:$0xff] %v3755_v21  ;;  %v3765_v24 = vld [vmem:[#allocation3 + $0x20] sm:$0xff]  ;;  %v3771_v26 = vld [vmem:[#allocation3 + $0x8] sm:$0xff] }
  0x26   :  { %996 = vmatprep.mubr.f32.mxu0 %v4565_v0  ;;  %1067 = vmatprep.mubr.f32.mxu1 %v4565_v0  ;;  %4708 = vst [vmem:[#allocation31_spill] sm:$0xff] %v3761_v23  ;;  %4709 = vst [vmem:[#allocation32_spill] sm:$0xff] %v3765_v24  ;;  %v3773_v27 = vld [vmem:[#allocation3 + $0x18] sm:$0xff] }
  0x27   :  { %3129 = vmatmul.mubr.msk.f32.vlgmr.msra.gmra.mxu0 %vm67_vm2, %v929_v22  ;;  %3132 = vmatmul.mubr.msk.f32.vlgmr.msra.gmra.mxu1 %vm67_vm2, %v929_v22  ;;  %v3759_v22 = vld [vmem:[#allocation3 + $0x28] sm:$0xff]  ;;  %4711 = vst [vmem:[#allocation34_spill] sm:$0xff] %v3771_v26  ;;  %4712 = vst [vmem:[#allocation35_spill] sm:$0xff] %v3773_v27 }
  0x28   :  { %3133 = vmatprep.subr.msk.mxu0 %vm70_vm0, %v3461_v3  ;;  %3136 = vmatprep.subr.msk.mxu1 %vm70_vm0, %v3465_v4  ;;  %4707 = vst [vmem:[#allocation30_spill] sm:$0xff] %v3759_v22 }
  0x29   :  { %3134 = vmatpush1.msk.msra.mxu0 %vm70_vm0, %v3452_v1  ;;  %3137 = vmatpush1.msk.msra.mxu1 %vm70_vm0, %v3457_v2 }
  0x2a   :  { %1167 = vmatprep.mubr.f32.mxu0 %v4565_v0  ;;  %1238 = vmatprep.mubr.f32.mxu1 %v4565_v0 }
  0x2b   :  { %3135 = vmatmul.mubr.msk.f32.vlgmr.msra.gmra.mxu0 %vm67_vm2, %v1100_v25  ;;  %3138 = vmatmul.mubr.msk.f32.vlgmr.msra.gmra.mxu1 %vm67_vm2, %v1100_v25  ;;  %v3767_v25 = vld [vmem:[#allocation3 + $0x30] sm:$0xff] }
  0x2c   :  { %3139 = vmatprep.subr.msk.mxu0 %vm70_vm0, %v3461_v3  ;;  %3142 = vmatprep.subr.msk.mxu1 %vm70_vm0, %v3465_v4  ;;  %v3701_v3 = vld [vmem:[#allocation3 + $0xd8] sm:$0xff]  ;;  %v3705_v4 = vld [vmem:[#allocation3 + $0xc0] sm:$0xff]  ;;  %4710 = vst [vmem:[#allocation33_spill] sm:$0xff] %v3767_v25 }
  0x2d   :  { %3140 = vmatpush1.msk.msra.mxu0 %vm70_vm0, %v3452_v1  ;;  %3143 = vmatpush1.msk.msra.mxu1 %vm70_vm0, %v3457_v2  ;;  %v3695_v1 = vld [vmem:[#allocation3 + $0xf0] sm:$0xff]  ;;  %v3699_v2 = vld [vmem:[#allocation3 + $0xc8] sm:$0xff]  ;;  %4688 = vst [vmem:[#allocation11_spill] sm:$0xff] %v3701_v3  ;;  %4689 = vst [vmem:[#allocation12_spill] sm:$0xff] %v3705_v4 }
  0x2e   :  { %1338 = vmatprep.mubr.f32.mxu0 %v4565_v0  ;;  %1409 = vmatprep.mubr.f32.mxu1 %v4565_v0  ;;  %v3781_v0 = vld [vmem:[#allocation3 + $0x10] sm:$0xff] }
  0x2f   :  { %1505 = vmatprep.subr.mxu0 %v3586_v28  ;;  %1576 = vmatprep.subr.mxu1 %v3588_v29  ;;  %4714 = vst [vmem:[#allocation37_spill] sm:$0xff] %v3781_v0 }
  0x30   :  { %3141 = vmatmul.mubr.msk.f32.vlgmr.msra.gmra.mxu0 %vm67_vm2, %v1271_v30  ;;  %3144 = vmatmul.mubr.msk.f32.vlgmr.msra.gmra.mxu1 %vm67_vm2, %v1271_v30  ;;  %v3777_v30 = vld [vmem:[#allocation3] sm:$0xff] }
  0x31   :  { %1506 = vmatpush1.msra.mxu0 %v3597_v31  ;;  %1577 = vmatpush1.msra.mxu1 %v3599_v32  ;;  %4713 = vst [vmem:[#allocation36_spill] sm:$0xff] %v3777_v30 }
  0x32   :  { %1507 = vmatprep.subr.mxu0 %v3603_v33  ;;  %1578 = vmatprep.subr.mxu1 %v3605_v34 }
  0x33   :  { %1508 = vmatpush1.msra.mxu0 %v3609_v35  ;;  %1579 = vmatpush1.msra.mxu1 %v3611_v36 }
  0x34   :  { %1509 = vmatprep.subr.mxu0 %v3615_v37  ;;  %1580 = vmatprep.subr.mxu1 %v3617_v38 }
  0x35   :  { %1510 = vmatpush1.msra.mxu0 %v3621_v39  ;;  %1581 = vmatpush1.msra.mxu1 %v3623_v40 }
  0x36   :  { %1511 = vmatprep.subr.mxu0 %v3627_v41  ;;  %1582 = vmatprep.subr.mxu1 %v3629_v42 }
  0x37   :  { %1512 = vmatpush1.msra.mxu0 %v3633_v43  ;;  %1583 = vmatpush1.msra.mxu1 %v3635_v44 }
  0x38   :  { %1513 = vmatprep.subr.mxu0 %v3639_v45  ;;  %1584 = vmatprep.subr.mxu1 %v3641_v46 }
  0x39   :  { %1514 = vmatpush1.msra.mxu0 %v3645_v47  ;;  %1585 = vmatpush1.msra.mxu1 %v3647_v48 }
  0x3a   :  { %1515 = vmatprep.subr.mxu0 %v3651_v49  ;;  %1586 = vmatprep.subr.mxu1 %v3653_v50 }
  0x3b   :  { %1516 = vmatpush1.msra.mxu0 %v3657_v51  ;;  %1587 = vmatpush1.msra.mxu1 %v3659_v52 }
  0x3c   :  { %1517 = vmatprep.subr.mxu0 %v3663_v53  ;;  %1588 = vmatprep.subr.mxu1 %v3665_v54 }
  0x3d   :  { %1518 = vmatpush1.msra.mxu0 %v3669_v55  ;;  %1589 = vmatpush1.msra.mxu1 %v3671_v56 }
  0x3e   :  { %1519 = vmatprep.subr.mxu0 %v3675_v57  ;;  %1590 = vmatprep.subr.mxu1 %v3677_v58 }
  0x3f   :  { %1520 = vmatpush1.msra.mxu0 %v3681_v59  ;;  %1591 = vmatpush1.msra.mxu1 %v3683_v60 }
  0x40   :  { %1521 = vmatprep.subr.mxu0 %v3687_v61  ;;  %1592 = vmatprep.subr.mxu1 %v3689_v62 }
  0x41   :  { %1522 = vmatpush1.msra.mxu0 %v3693_v63  ;;  %1593 = vmatpush1.msra.mxu1 %v3695_v1 }
  0x42   :  { %1523 = vmatprep.subr.mxu0 %v3699_v2  ;;  %1594 = vmatprep.subr.mxu1 %v3701_v3 }
  0x43   :  { %1524 = vmatpush1.msra.mxu0 %v3705_v4  ;;  %1595 = vmatpush1.msra.mxu1 %v3707_v5 }
  0x44   :  { %1525 = vmatprep.subr.mxu0 %v3711_v6  ;;  %1596 = vmatprep.subr.mxu1 %v3713_v7 }
  0x45   :  { %1526 = vmatpush1.msra.mxu0 %v3717_v8  ;;  %1597 = vmatpush1.msra.mxu1 %v3719_v9 }
  0x46   :  { %1527 = vmatprep.subr.mxu0 %v3723_v10  ;;  %1598 = vmatprep.subr.mxu1 %v3725_v11 }
  0x47   :  { %1528 = vmatpush1.msra.mxu0 %v3729_v12  ;;  %1599 = vmatpush1.msra.mxu1 %v3731_v13 }
  0x48   :  { %1529 = vmatprep.subr.mxu0 %v3735_v14  ;;  %1600 = vmatprep.subr.mxu1 %v3737_v15 }
  0x49   :  { %1530 = vmatpush1.msra.mxu0 %v3741_v16  ;;  %1601 = vmatpush1.msra.mxu1 %v3743_v17 }
  0x4a   :  { %1531 = vmatprep.subr.mxu0 %v3747_v18  ;;  %1602 = vmatprep.subr.mxu1 %v3749_v19 }
  0x4b   :  { %1532 = vmatpush1.msra.mxu0 %v3753_v20  ;;  %1603 = vmatpush1.msra.mxu1 %v3755_v21  ;;  %v4715_v21 = vmov 0.0  }
  0x4c   :  { %1533 = vmatprep.subr.mxu0 %v3759_v22  ;;  %1604 = vmatprep.subr.mxu1 %v3761_v23 }
  0x4d   :  { %1534 = vmatpush1.msra.mxu0 %v3765_v24  ;;  %1605 = vmatpush1.msra.mxu1 %v3767_v25 }
  0x4e   :  { %1535 = vmatprep.subr.mxu0 %v3771_v26  ;;  %1606 = vmatprep.subr.mxu1 %v3773_v27 }
  0x4f   :  { %1536 = vmatpush1.msra.mxu0 %v3777_v30  ;;  %1569 = vmatprep.mubr.f32.mxu0 %v4715_v21 }
  0x50   :  { %1607 = vmatpush1.msra.mxu1 %v3781_v0  ;;  %1640 = vmatprep.mubr.f32.mxu1 %v4715_v21 }
  0x51   :  { %1570 = vmatmul.mubr.f32.vlgmr.msra.gmra.mxu0 %v4715_v21  ;;  %1641 = vmatmul.mubr.f32.vlgmr.msra.gmra.mxu1 %v4715_v21 }
  0x52   :  { %1702 = vmatprep.subr.mxu0 %v3586_v28  ;;  %1773 = vmatprep.subr.mxu1 %v3588_v29 }
  0x53   :  { %1703 = vmatpush1.msra.mxu0 %v3597_v31  ;;  %1774 = vmatpush1.msra.mxu1 %v3599_v32 }
  0x54   :  { %1704 = vmatprep.subr.mxu0 %v3603_v33  ;;  %1775 = vmatprep.subr.mxu1 %v3605_v34 }
  0x55   :  { %1705 = vmatpush1.msra.mxu0 %v3609_v35  ;;  %1776 = vmatpush1.msra.mxu1 %v3611_v36 }
  0x56   :  { %1706 = vmatprep.subr.mxu0 %v3615_v37  ;;  %1777 = vmatprep.subr.mxu1 %v3617_v38 }
  0x57   :  { %1707 = vmatpush1.msra.mxu0 %v3621_v39  ;;  %1778 = vmatpush1.msra.mxu1 %v3623_v40 }
  0x58   :  { %1708 = vmatprep.subr.mxu0 %v3627_v41  ;;  %1779 = vmatprep.subr.mxu1 %v3629_v42 }
  0x59   :  { %1709 = vmatpush1.msra.mxu0 %v3633_v43  ;;  %1780 = vmatpush1.msra.mxu1 %v3635_v44 }
  0x5a   :  { %1710 = vmatprep.subr.mxu0 %v3639_v45  ;;  %1781 = vmatprep.subr.mxu1 %v3641_v46 }
  0x5b   :  { %1711 = vmatpush1.msra.mxu0 %v3645_v47  ;;  %1782 = vmatpush1.msra.mxu1 %v3647_v48 }
  0x5c   :  { %1712 = vmatprep.subr.mxu0 %v3651_v49  ;;  %1783 = vmatprep.subr.mxu1 %v3653_v50 }
  0x5d   :  { %1713 = vmatpush1.msra.mxu0 %v3657_v51  ;;  %1784 = vmatpush1.msra.mxu1 %v3659_v52 }
  0x5e   :  { %1714 = vmatprep.subr.mxu0 %v3663_v53  ;;  %1785 = vmatprep.subr.mxu1 %v3665_v54 }
  0x5f   :  { %1715 = vmatpush1.msra.mxu0 %v3669_v55  ;;  %1786 = vmatpush1.msra.mxu1 %v3671_v56 }
  0x60   :  { %1716 = vmatprep.subr.mxu0 %v3675_v57  ;;  %1787 = vmatprep.subr.mxu1 %v3677_v58 }
  0x61   :  { %1717 = vmatpush1.msra.mxu0 %v3681_v59  ;;  %1788 = vmatpush1.msra.mxu1 %v3683_v60 }
  0x62   :  { %1718 = vmatprep.subr.mxu0 %v3687_v61  ;;  %1789 = vmatprep.subr.mxu1 %v3689_v62 }
  0x63   :  { %1719 = vmatpush1.msra.mxu0 %v3693_v63  ;;  %1790 = vmatpush1.msra.mxu1 %v3695_v1 }
  0x64   :  { %1720 = vmatprep.subr.mxu0 %v3699_v2  ;;  %1791 = vmatprep.subr.mxu1 %v3701_v3 }
  0x65   :  { %1721 = vmatpush1.msra.mxu0 %v3705_v4  ;;  %1792 = vmatpush1.msra.mxu1 %v3707_v5 }
  0x66   :  { %1722 = vmatprep.subr.mxu0 %v3711_v6  ;;  %1793 = vmatprep.subr.mxu1 %v3713_v7 }
  0x67   :  { %1723 = vmatpush1.msra.mxu0 %v3717_v8  ;;  %1794 = vmatpush1.msra.mxu1 %v3719_v9 }
  0x68   :  { %1724 = vmatprep.subr.mxu0 %v3723_v10  ;;  %1795 = vmatprep.subr.mxu1 %v3725_v11  ;;  %v4716_v10 = vld [vmem:[#allocation29_spill] sm:$0xff] }
  0x69   :  { %1725 = vmatpush1.msra.mxu0 %v3729_v12  ;;  %1796 = vmatpush1.msra.mxu1 %v3731_v13 }
  0x6a   :  { %1726 = vmatprep.subr.mxu0 %v3735_v14  ;;  %1797 = vmatprep.subr.mxu1 %v3737_v15 }
  0x6b   :  { %1727 = vmatpush1.msra.mxu0 %v3741_v16  ;;  %1798 = vmatpush1.msra.mxu1 %v3743_v17 }
  0x6c   :  { %1728 = vmatprep.subr.mxu0 %v3747_v18  ;;  %1799 = vmatprep.subr.mxu1 %v3749_v19 }
  0x6d   :  { %1729 = vmatpush1.msra.mxu0 %v3753_v20  ;;  %1800 = vmatpush1.msra.mxu1 %v4716_v10 }
  0x6e   :  { %1730 = vmatprep.subr.mxu0 %v3759_v22  ;;  %1801 = vmatprep.subr.mxu1 %v3761_v23  ;;  %v38_v23 = vlaneseq }
  0x6f   :  { %1731 = vmatpush1.msra.mxu0 %v3765_v24  ;;  %1802 = vmatpush1.msra.mxu1 %v3767_v25 }
  0x70   :  { %1732 = vmatprep.subr.mxu0 %v3771_v26  ;;  %1803 = vmatprep.subr.mxu1 %v3773_v27  ;;  %v39_v24 = vshrl.u32 %v38_v23, 7  ;;  %v36_v27 = vld [vmem:[%s4563_s3] sm:$0xf]  ;;  %s3418_s3 = smov [#allocation6]  }
  0x71   :  { %1733 = vmatpush1.msra.mxu0 %v3777_v30  ;;  %1766 = vmatprep.mubr.f32.mxu0 %v4715_v21  ;;  %s3088_s29 = sshll.u32 %s3418_s3, 4  ;;  %s3089_s29 = int_to_ptr.vmem [resolvable:$true] %s3088_s29 }
  0x72   :  { %1804 = vmatpush1.msra.mxu1 %v3781_v0  ;;  %1837 = vmatprep.mubr.f32.mxu1 %v4715_v21  ;;  %v40_v22 = vsub.s32 0, %v39_v24  ;;  %v48_v25 = vsub.s32 2, %v39_v24  ;;  %v44_v10 = vsub.s32 1, %v39_v24  ;;  %v3417_v0 = vmov 1983009808   ;;  %s3389_s30 = scalar_lea.vmem %s3089_s29, 32  ;;  %p3394_p6 = scmp.lt.s32.totalorder %s3089_s29, %s3089_s29 }
  0x73   :  { %1899 = vmatprep.subr.mxu0 %v3586_v28  ;;  %1970 = vmatprep.subr.mxu1 %v3588_v29  ;;  %v228_v20 = vunpack.c.l.s4 %v3417_v0  ;;  %v52_v21 = vsub.s32 3, %v39_v24  ;;  %p3390_p5 = scmp.ne.s32.totalorder %s3089_s29, %s3389_s30  ;;  %p3395_p7 = scmp.lt.s32.totalorder %s3389_s30, %s3389_s30 }
  0x74   :  { %v3870_v29 = vrot.slane %v36_v27, %v40_v22  ;;  %v3872_v23 = vrot.slane %v36_v27, %v48_v25  ;;  %v3874_v18 = vrot.slane %v36_v27, %v44_v10 }
  0x75   :  { %v229_v15 = vunpack.c.0.s8 %v228_v20  ;;  %v3876_v14 = vrot.slane %v36_v27, %v52_v21  ;;  %p3396_p8 = por %p3395_p7, %p3394_p6 }
  0x77   :  { %v3882_v7 = vsub.s32 %v229_v15, %v39_v24  ;;  %p3397_p9 = pnand %p3396_p8, %p3390_p5 }
  0xd3   :  { %v3862_v26 = vpop.f32.mrf.mxu0  ;;  %v3864_v30 = vpop.f32.mrf.mxu1 }
  0xd5   :  { %v3866_v19 = vpop.f32.mrf.mxu0  ;;  %v3868_v28 = vpop.f32.mrf.mxu1 }
  0xd7   :  { %v314_v17 = vpop.f32.mrf.mxu0  ;;  %v385_v16 = vpop.f32.mrf.mxu1 }
  0xd8   :  { %v315_v13 = vadd.f32 %v314_v17, %v3870_v29  ;;  %v386_v0 = vadd.f32 %v385_v16, %v3872_v23 }
  0xd9   :  { %v316_v12 = vpop.f32.mrf.mxu0  ;;  %v387_v11 = vpop.f32.mrf.mxu1 }
  0xda   :  { %v317_v9 = vadd.f32 %v316_v12, %v3874_v18  ;;  %v388_v22 = vadd.f32 %v387_v11, %v3876_v14 }
  0xdb   :  { %v485_v8 = vpop.f32.mrf.mxu0  ;;  %v556_v25 = vpop.f32.mrf.mxu1 }
  0xdc   :  { %v394_v10 = vcombine.low %v315_v13, %v317_v9  ;;  %v395_v6 = vcombine.low %v386_v0, %v388_v22  ;;  %v486_v20 = vadd.f32 %v485_v8, %v3870_v29  ;;  %v557_v21 = vadd.f32 %v556_v25, %v3872_v23 }
  0xdd   :  { %v487_v27 = vpop.f32.mrf.mxu0  ;;  %v558_v17 = vpop.f32.mrf.mxu1 }
  0xde   :  { %v3887_v16 = vrot.slane %v394_v10, %v3882_v7  ;;  %v3890_v5 = vrot.slane %v395_v6, %v3882_v7  ;;  %v488_v11 = vadd.f32 %v487_v27, %v3874_v18  ;;  %v559_v12 = vadd.f32 %v558_v17, %v3876_v14 }
  0xdf   :  { %v656_v15 = vpop.f32.mrf.mxu0  ;;  %v727_v24 = vpop.f32.mrf.mxu1 }
  0xe0   :  { %4717 = vst [vmem:[#allocation38_spill] sm:$0xff] %v3887_v16  ;;  %4718 = vst [vmem:[#allocation39_spill] sm:$0xff] %v3890_v5  ;;  %v565_v8 = vcombine.low %v486_v20, %v488_v11  ;;  %v566_v13 = vcombine.low %v557_v21, %v559_v12  ;;  %v657_v0 = vadd.f32 %v656_v15, %v3870_v29 }
  0xe1   :  { %v728_v22 = vadd.f32 %v727_v24, %v3872_v23  ;;  %v658_v25 = vpop.f32.mrf.mxu0  ;;  %v729_v10 = vpop.f32.mrf.mxu1 }
  0xe2   :  { %v3899_v6 = vrot.slane %v565_v8, %v3882_v7  ;;  %v3902_v27 = vrot.slane %v566_v13, %v3882_v7  ;;  %v659_v17 = vadd.f32 %v658_v25, %v3874_v18  ;;  %v730_v4 = vadd.f32 %v729_v10, %v3876_v14 }
  0xe3   :  { %v827_v3 = vpop.f32.mrf.mxu0  ;;  %v898_v9 = vpop.f32.mrf.mxu1 }
  0xe4   :  { %4719 = vst [vmem:[#allocation40_spill] sm:$0xff] %v3899_v6  ;;  %4720 = vst [vmem:[#allocation41_spill] sm:$0xff] %v3902_v27  ;;  %v736_v21 = vcombine.low %v657_v0, %v659_v17  ;;  %v737_v11 = vcombine.low %v728_v22, %v730_v4  ;;  %v828_v12 = vadd.f32 %v827_v3, %v3870_v29 }
  0xe5   :  { %v899_v15 = vadd.f32 %v898_v9, %v3872_v23  ;;  %v829_v24 = vpop.f32.mrf.mxu0  ;;  %v900_v8 = vpop.f32.mrf.mxu1 }
  0xe6   :  { %v3911_v13 = vrot.slane %v736_v21, %v3882_v7  ;;  %v3914_v25 = vrot.slane %v737_v11, %v3882_v7  ;;  %v830_v10 = vadd.f32 %v829_v24, %v3874_v18  ;;  %v901_v5 = vadd.f32 %v900_v8, %v3876_v14 }
  0xe7   :  { %v998_v16 = vpop.f32.mrf.mxu0  ;;  %v1069_v20 = vpop.f32.mrf.mxu1 }
  0xe8   :  { %4721 = vst [vmem:[#allocation42_spill] sm:$0xff] %v3911_v13  ;;  %4722 = vst [vmem:[#allocation43_spill] sm:$0xff] %v3914_v25  ;;  %v907_v3 = vcombine.low %v828_v12, %v830_v10  ;;  %v908_v0 = vcombine.low %v899_v15, %v901_v5  ;;  %v999_v9 = vadd.f32 %v998_v16, %v3870_v29  ;;  %v4757_v13 = vmov 0.0  }
  0xe9   :  { %v1070_v22 = vadd.f32 %v1069_v20, %v3872_v23  ;;  %v1000_v17 = vpop.f32.mrf.mxu0  ;;  %v1071_v21 = vpop.f32.mrf.mxu1 }
  0xea   :  { %v3923_v11 = vrot.slane %v907_v3, %v3882_v7  ;;  %v3926_v24 = vrot.slane %v908_v0, %v3882_v7  ;;  %v1001_v8 = vadd.f32 %v1000_v17, %v3874_v18  ;;  %v1072_v27 = vadd.f32 %v1071_v21, %v3876_v14 }
  0xeb   :  { %v1169_v6 = vpop.f32.mrf.mxu0  ;;  %v1240_v4 = vpop.f32.mrf.mxu1 }
  0xec   :  { %4723 = vst [vmem:[#allocation44_spill] sm:$0xff] %v3923_v11  ;;  %4724 = vst [vmem:[#allocation45_spill] sm:$0xff] %v3926_v24  ;;  %v1078_v16 = vcombine.low %v999_v9, %v1001_v8  ;;  %v1079_v12 = vcombine.low %v1070_v22, %v1072_v27  ;;  %v1170_v20 = vadd.f32 %v1169_v6, %v3870_v29  ;;  %v4756_v11 = vld [vmem:[#allocation36_spill] sm:$0xff] }
  0xed   :  { %v1241_v15 = vadd.f32 %v1240_v4, %v3872_v23  ;;  %v1171_v10 = vpop.f32.mrf.mxu0  ;;  %v1242_v3 = vpop.f32.mrf.mxu1 }
  0xee   :  { %v3935_v0 = vrot.slane %v1078_v16, %v3882_v7  ;;  %v3938_v17 = vrot.slane %v1079_v12, %v3882_v7  ;;  %v1172_v21 = vadd.f32 %v1171_v10, %v3874_v18  ;;  %v1243_v25 = vadd.f32 %v1242_v3, %v3876_v14 }
  0xf0   :  { %4725 = vst [vmem:[#allocation46_spill] sm:$0xff] %v3935_v0  ;;  %4726 = vst [vmem:[#allocation47_spill] sm:$0xff] %v3938_v17  ;;  %v1249_v27 = vcombine.low %v1170_v20, %v1172_v21  ;;  %v1250_v22 = vcombine.low %v1241_v15, %v1243_v25  ;;  %v1340_v6 = vpop.f32.mrf.mxu0  ;;  %v1411_v8 = vpop.f32.mrf.mxu1  ;;  %v4754_v17 = vld [vmem:[#allocation34_spill] sm:$0xff]  ;;  %v4755_v0 = vld [vmem:[#allocation35_spill] sm:$0xff] }
  0xf1   :  { %v1341_v4 = vadd.f32 %v1340_v6, %v3870_v29  ;;  %v1412_v5 = vadd.f32 %v1411_v8, %v3872_v23  ;;  %v148_v6 = vadd.f32 %v3866_v19, %v3874_v18  ;;  %v146_v8 = vadd.f32 %v3862_v26, %v3870_v29 }
  0xf2   :  { %v3947_v16 = vrot.slane %v1249_v27, %v3882_v7  ;;  %v3950_v12 = vrot.slane %v1250_v22, %v3882_v7  ;;  %v1342_v10 = vpop.f32.mrf.mxu0  ;;  %v1413_v24 = vpop.f32.mrf.mxu1 }
  0xf3   :  { %v1343_v3 = vadd.f32 %v1342_v10, %v3874_v18  ;;  %v1414_v9 = vadd.f32 %v1413_v24, %v3876_v14  ;;  %v219_v24 = vadd.f32 %v3868_v28, %v3876_v14 }
  0xf4   :  { %4727 = vst [vmem:[#allocation48_spill] sm:$0xff] %v3947_v16  ;;  %4728 = vst [vmem:[#allocation49_spill] sm:$0xff] %v3950_v12  ;;  %v4752_v12 = vld [vmem:[#allocation32_spill] sm:$0xff]  ;;  %v4753_v16 = vld [vmem:[#allocation33_spill] sm:$0xff] }
  0xf5   :  { %v1420_v20 = vcombine.low %v1341_v4, %v1343_v3  ;;  %v1421_v15 = vcombine.low %v1412_v5, %v1414_v9  ;;  %v217_v5 = vadd.f32 %v3864_v30, %v3872_v23  ;;  %v225_v9 = vcombine.low %v146_v8, %v148_v6 }
  0xf7   :  { %v3957_v21 = vrot.slane %v1420_v20, %v3882_v7  ;;  %v3960_v27 = vrot.slane %v1421_v15, %v3882_v7  ;;  %v226_v4 = vcombine.low %v217_v5, %v219_v24  ;;  %v233_v22 = vrot.slane %v225_v9, %v3882_v7 }
  0xf9   :  { %4729 = vst [vmem:[#allocation50_spill] sm:$0xff] %v3957_v21  ;;  %4730 = vst [vmem:[#allocation51_spill] sm:$0xff] %v3960_v27  ;;  %v240_v25 = vrot.slane %v226_v4, %v3882_v7 }
  0xfb   :  { %v241_v29 = vcombine.low %v233_v22, %v240_v25 }
 0x111   :  { %v1571_v10 = vpop.f32.mrf.mxu0  ;;  %v1642_v3 = vpop.f32.mrf.mxu1 }
 0x113   :  { %v1573_v20 = vpop.f32.mrf.mxu0  ;;  %v1644_v15 = vpop.f32.mrf.mxu1 }
 0x114   :  { %v1651_v18 = vcombine.low %v1571_v10, %v1573_v20  ;;  %v1652_v19 = vcombine.low %v1642_v3, %v1644_v15 }
 0x116   :  { %v1659_v28 = vrot.slane %v1651_v18, %v3882_v7  ;;  %v1666_v14 = vrot.slane %v1652_v19, %v3882_v7 }
 0x118   :  { %v1667_v26 = vcombine.low %v1659_v28, %v1666_v14 }
 0x11a   :  { %v1669_v27 = vadd.f32 %v1667_v26, %v241_v29  ;;  %v4732_v26 = vld [vmem:[#allocation12_spill] sm:$0xff] }
 0x11c   :  { %v3145_v30 = vmul.f32 -1.442695, %v1669_v27  ;;  %v1677_v23 = vrot.slane %v1669_v27, 2  ;;  %v1688_v24 = vrot.slane %v1669_v27, 6  ;;  %v1685_v9 = vrot.slane %v1669_v27, 4 }
 0x11e   :  { %3177 = vpow2.f32 %v3145_v30  ;;  %v3146_v6 = vmul.f32 -1.442695, %v1677_v23  ;;  %v3147_v8 = vmul.f32 -1.442695, %v1688_v24  ;;  %v4733_v30 = vld [vmem:[#allocation13_spill] sm:$0xff]  ;;  %v4734_v23 = vld [vmem:[#allocation14_spill] sm:$0xff] }
 0x11f   :  { %v4736_v24 = vld [vmem:[#allocation16_spill] sm:$0xff] }
 0x120   :  { %3179 = vpow2.f32 %v3146_v6  ;;  %v4735_v6 = vld [vmem:[#allocation15_spill] sm:$0xff] }
 0x121   :  { %3181 = vpow2.f32 %v3147_v8  ;;  %v4737_v8 = vld [vmem:[#allocation17_spill] sm:$0xff] }
 0x12b   :  { %v3178_v5 = vpop.eup %3177 }
 0x12c   :  { %v1673_v21 = vadd.f32 1.0, %v3178_v5  ;;  %v4738_v5 = vld [vmem:[#allocation18_spill] sm:$0xff] }
 0x12d   :  { %v3180_v4 = vpop.eup %3179 }
 0x12e   :  { %3183 = vrcp.f32 %v1673_v21  ;;  %v1682_v10 = vadd.f32 1.0, %v3180_v4  ;;  %v3182_v3 = vpop.eup %3181  ;;  %v4731_v21 = vld [vmem:[#allocation11_spill] sm:$0xff]  ;;  %v4740_v4 = vld [vmem:[#allocation20_spill] sm:$0xff] }
 0x12f   :  { %3185 = vtanh.f32 %v1685_v9  ;;  %v1693_v15 = vadd.f32 1.0, %v3182_v3  ;;  %v4739_v9 = vld [vmem:[#allocation19_spill] sm:$0xff]  ;;  %v4742_v3 = vld [vmem:[#allocation22_spill] sm:$0xff] }
 0x130   :  { %3187 = vrcp.f32 %v1682_v10  ;;  %v4741_v10 = vld [vmem:[#allocation21_spill] sm:$0xff] }
 0x131   :  { %3189 = vrcp.f32 %v1693_v15  ;;  %v4746_v15 = vld [vmem:[#allocation26_spill] sm:$0xff] }
 0x13b   :  { %v3184_v25 = vpop.eup %3183 }
 0x13c   :  { %v3186_v22 = vpop.eup %3185 }
 0x13d   :  { %v3188_v20 = vpop.eup %3187  ;;  %v1697_v19 = vmul.f32 %v3186_v22, %v3184_v25  ;;  %v4743_v25 = vld [vmem:[#allocation23_spill] sm:$0xff]  ;;  %v4744_v22 = vld [vmem:[#allocation24_spill] sm:$0xff] }
 0x13e   :  { %v1696_v18 = vmul.f32 0.0, %v3188_v20  ;;  %v3190_v27 = vpop.eup %3189  ;;  %v4745_v20 = vld [vmem:[#allocation25_spill] sm:$0xff] }
 0x140   :  { %v3976_v28 = vadd.f32 %v1697_v19, %v1696_v18  ;;  %v4747_v18 = vld [vmem:[#allocation27_spill] sm:$0xff]  ;;  %v4748_v19 = vld [vmem:[#allocation28_spill] sm:$0xff] }
 0x142   :  { %3191 = vtanh.f32 %v3976_v28 }
 0x14f   :  { %v3192_v14 = vpop.eup %3191 }
 0x150   :  { %v1700_v29 = vmul.f32 %v3192_v14, %v3190_v27  ;;  %v4749_v27 = vld [vmem:[#allocation29_spill] sm:$0xff]  ;;  %v4750_v14 = vld [vmem:[#allocation30_spill] sm:$0xff] }
 0x152   :  { %1767 = vmatmul.mubr.f32.vlgmr.msra.gmra.mxu0 %v1700_v29  ;;  %1838 = vmatmul.mubr.f32.vlgmr.msra.gmra.mxu1 %v1700_v29  ;;  %v4751_v29 = vld [vmem:[#allocation31_spill] sm:$0xff] }
 0x153   :  { %1900 = vmatpush1.msra.mxu0 %v3597_v31  ;;  %1971 = vmatpush1.msra.mxu1 %v3599_v32 }
 0x154   :  { %1901 = vmatprep.subr.mxu0 %v3603_v33  ;;  %1972 = vmatprep.subr.mxu1 %v3605_v34 }
 0x155   :  { %1902 = vmatpush1.msra.mxu0 %v3609_v35  ;;  %1973 = vmatpush1.msra.mxu1 %v3611_v36 }
 0x156   :  { %1903 = vmatprep.subr.mxu0 %v3615_v37  ;;  %1974 = vmatprep.subr.mxu1 %v3617_v38 }
 0x157   :  { %1904 = vmatpush1.msra.mxu0 %v3621_v39  ;;  %1975 = vmatpush1.msra.mxu1 %v3623_v40 }
 0x158   :  { %1905 = vmatprep.subr.mxu0 %v3627_v41  ;;  %1976 = vmatprep.subr.mxu1 %v3629_v42 }
 0x159   :  { %1906 = vmatpush1.msra.mxu0 %v3633_v43  ;;  %1977 = vmatpush1.msra.mxu1 %v3635_v44 }
 0x15a   :  { %1907 = vmatprep.subr.mxu0 %v3639_v45  ;;  %1978 = vmatprep.subr.mxu1 %v3641_v46 }
 0x15b   :  { %1908 = vmatpush1.msra.mxu0 %v3645_v47  ;;  %1979 = vmatpush1.msra.mxu1 %v3647_v48 }
 0x15c   :  { %1909 = vmatprep.subr.mxu0 %v3651_v49  ;;  %1980 = vmatprep.subr.mxu1 %v3653_v50 }
 0x15d   :  { %1910 = vmatpush1.msra.mxu0 %v3657_v51  ;;  %1981 = vmatpush1.msra.mxu1 %v3659_v52 }
 0x15e   :  { %1911 = vmatprep.subr.mxu0 %v3663_v53  ;;  %1982 = vmatprep.subr.mxu1 %v3665_v54 }
 0x15f   :  { %1912 = vmatpush1.msra.mxu0 %v3669_v55  ;;  %1983 = vmatpush1.msra.mxu1 %v3671_v56 }
 0x160   :  { %1913 = vmatprep.subr.mxu0 %v3675_v57  ;;  %1984 = vmatprep.subr.mxu1 %v3677_v58 }
 0x161   :  { %1914 = vmatpush1.msra.mxu0 %v3681_v59  ;;  %1985 = vmatpush1.msra.mxu1 %v3683_v60 }
 0x162   :  { %1915 = vmatprep.subr.mxu0 %v3687_v61  ;;  %1986 = vmatprep.subr.mxu1 %v3689_v62 }
 0x163   :  { %1916 = vmatpush1.msra.mxu0 %v3693_v63  ;;  %1987 = vmatpush1.msra.mxu1 %v3695_v1 }
 0x164   :  { %1917 = vmatprep.subr.mxu0 %v3699_v2  ;;  %1988 = vmatprep.subr.mxu1 %v4731_v21 }
 0x165   :  { %1918 = vmatpush1.msra.mxu0 %v4732_v26  ;;  %1989 = vmatpush1.msra.mxu1 %v4733_v30 }
 0x166   :  { %1919 = vmatprep.subr.mxu0 %v4734_v23  ;;  %1990 = vmatprep.subr.mxu1 %v4735_v6 }
 0x167   :  { %1920 = vmatpush1.msra.mxu0 %v4736_v24  ;;  %1991 = vmatpush1.msra.mxu1 %v4737_v8 }
 0x168   :  { %1921 = vmatprep.subr.mxu0 %v4738_v5  ;;  %1992 = vmatprep.subr.mxu1 %v4739_v9 }
 0x169   :  { %1922 = vmatpush1.msra.mxu0 %v4740_v4  ;;  %1993 = vmatpush1.msra.mxu1 %v4741_v10 }
 0x16a   :  { %1923 = vmatprep.subr.mxu0 %v4742_v3  ;;  %1994 = vmatprep.subr.mxu1 %v4743_v25  ;;  %v4762_v25 = vld [vmem:[#allocation39_spill] sm:$0xff] }
 0x16b   :  { %1924 = vmatpush1.msra.mxu0 %v4744_v22  ;;  %1995 = vmatpush1.msra.mxu1 %v4745_v20  ;;  %v4761_v22 = vld [vmem:[#allocation38_spill] sm:$0xff] }
 0x16c   :  { %1925 = vmatprep.subr.mxu0 %v4746_v15  ;;  %1996 = vmatprep.subr.mxu1 %v4747_v18  ;;  %v4758_v18 = vld [vmem:[#allocation37_spill] sm:$0xff] }
 0x16d   :  { %1926 = vmatpush1.msra.mxu0 %v4748_v19  ;;  %1997 = vmatpush1.msra.mxu1 %v4749_v27  ;;  %v4759_v27 = vld [vmem:[#allocation9_spill] sm:$0xff] }
 0x16e   :  { %1927 = vmatprep.subr.mxu0 %v4750_v14  ;;  %1998 = vmatprep.subr.mxu1 %v4751_v29  ;;  %v4760_v14 = vld [vmem:[#allocation10_spill] sm:$0xff] }
 0x16f   :  { %1928 = vmatpush1.msra.mxu0 %v4752_v12  ;;  %1999 = vmatpush1.msra.mxu1 %v4753_v16 }
 0x170   :  { %1929 = vmatprep.subr.mxu0 %v4754_v17  ;;  %2000 = vmatprep.subr.mxu1 %v4755_v0 }
 0x171   :  { %1930 = vmatpush1.msra.mxu0 %v4756_v11  ;;  %1963 = vmatprep.mubr.f32.mxu0 %v4757_v13 }
 0x172   :  { %2001 = vmatpush1.msra.mxu1 %v4758_v18  ;;  %2034 = vmatprep.mubr.f32.mxu1 %v4757_v13  ;;  %v4763_v18 = vcombine.low %v4761_v22, %v4762_v25 }
 0x173   :  { %2096 = vmatprep.subr.mxu0 %v4759_v27  ;;  %2167 = vmatprep.subr.mxu1 %v4760_v14 }
 0x212   :  { %v1768_v29 = vpop.f32.mrf.mxu0  ;;  %v1839_v12 = vpop.f32.mrf.mxu1 }
 0x214   :  { %v1770_v19 = vpop.f32.mrf.mxu0  ;;  %v1841_v16 = vpop.f32.mrf.mxu1 }
 0x215   :  { %v1848_v15 = vcombine.low %v1768_v29, %v1770_v19  ;;  %v1849_v17 = vcombine.low %v1839_v12, %v1841_v16 }
 0x217   :  { %v1856_v0 = vrot.slane %v1848_v15, %v3882_v7  ;;  %v1863_v11 = vrot.slane %v1849_v17, %v3882_v7 }
 0x219   :  { %v1864_v20 = vcombine.low %v1856_v0, %v1863_v11 }
 0x21b   :  { %v1866_v3 = vadd.f32 %v1864_v20, %v4763_v18 }
 0x21d   :  { %v3148_v13 = vmul.f32 -1.442695, %v1866_v3  ;;  %v1874_v10 = vrot.slane %v1866_v3, 2  ;;  %v1885_v14 = vrot.slane %v1866_v3, 6  ;;  %v1882_v5 = vrot.slane %v1866_v3, 4 }
 0x21f   :  { %3193 = vpow2.f32 %v3148_v13  ;;  %v3149_v27 = vmul.f32 -1.442695, %v1874_v10  ;;  %v3150_v4 = vmul.f32 -1.442695, %v1885_v14 }
 0x221   :  { %3195 = vpow2.f32 %v3149_v27 }
 0x222   :  { %3197 = vpow2.f32 %v3150_v4 }
 0x22c   :  { %v3194_v9 = vpop.eup %3193 }
 0x22d   :  { %v1870_v19 = vadd.f32 1.0, %v3194_v9 }
 0x22e   :  { %v3196_v16 = vpop.eup %3195 }
 0x22f   :  { %3199 = vrcp.f32 %v1870_v19  ;;  %v1879_v12 = vadd.f32 1.0, %v3196_v16  ;;  %v3198_v11 = vpop.eup %3197 }
 0x230   :  { %3201 = vtanh.f32 %v1882_v5  ;;  %v1890_v22 = vadd.f32 1.0, %v3198_v11 }
 0x231   :  { %3203 = vrcp.f32 %v1879_v12 }
 0x232   :  { %3205 = vrcp.f32 %v1890_v22 }
 0x23c   :  { %v3200_v0 = vpop.eup %3199 }
 0x23d   :  { %v3202_v17 = vpop.eup %3201 }
 0x23e   :  { %v3204_v25 = vpop.eup %3203  ;;  %v1894_v10 = vmul.f32 %v3202_v17, %v3200_v0 }
 0x23f   :  { %v1893_v13 = vmul.f32 %v3204_v25, %v3976_v28  ;;  %v3206_v9 = vpop.eup %3205 }
 0x241   :  { %v4051_v20 = vadd.f32 %v1894_v10, %v1893_v13  ;;  %v4133_v13 = vld [vmem:[#allocation3 + $0x1e0] sm:$0xff]  ;;  %v4136_v10 = vld [vmem:[#allocation3 + $0x1f0] sm:$0xff] }
 0x243   :  { %3207 = vtanh.f32 %v4051_v20 }
 0x250   :  { %v3208_v3 = vpop.eup %3207 }
 0x251   :  { %v1897_v4 = vmul.f32 %v3208_v3, %v3206_v9  ;;  %v4142_v9 = vld [vmem:[#allocation3 + $0x1d8] sm:$0xff]  ;;  %v4145_v3 = vld [vmem:[#allocation3 + $0x1c0] sm:$0xff] }
 0x253   :  { %1964 = vmatmul.mubr.f32.vlgmr.msra.gmra.mxu0 %v1897_v4  ;;  %2035 = vmatmul.mubr.f32.vlgmr.msra.gmra.mxu1 %v1897_v4  ;;  %v4148_v4 = vld [vmem:[#allocation3 + $0x1d0] sm:$0xff] }
 0x254   :  { %2097 = vmatpush1.msra.mxu0 %v3597_v31  ;;  %2168 = vmatpush1.msra.mxu1 %v3599_v32  ;;  %v4764_v31 = vld [vmem:[#allocation18_spill] sm:$0xff]  ;;  %v4765_v32 = vld [vmem:[#allocation19_spill] sm:$0xff] }
 0x255   :  { %2098 = vmatprep.subr.mxu0 %v3603_v33  ;;  %2169 = vmatprep.subr.mxu1 %v3605_v34  ;;  %v4766_v33 = vld [vmem:[#allocation20_spill] sm:$0xff]  ;;  %v4767_v34 = vld [vmem:[#allocation21_spill] sm:$0xff] }
 0x256   :  { %2099 = vmatpush1.msra.mxu0 %v3609_v35  ;;  %2170 = vmatpush1.msra.mxu1 %v3611_v36  ;;  %v4768_v35 = vld [vmem:[#allocation22_spill] sm:$0xff]  ;;  %v4769_v36 = vld [vmem:[#allocation23_spill] sm:$0xff] }
 0x257   :  { %2100 = vmatprep.subr.mxu0 %v3615_v37  ;;  %2171 = vmatprep.subr.mxu1 %v3617_v38  ;;  %v4770_v37 = vld [vmem:[#allocation24_spill] sm:$0xff]  ;;  %v4771_v38 = vld [vmem:[#allocation25_spill] sm:$0xff] }
 0x258   :  { %2101 = vmatpush1.msra.mxu0 %v3621_v39  ;;  %2172 = vmatpush1.msra.mxu1 %v3623_v40  ;;  %v4772_v39 = vld [vmem:[#allocation26_spill] sm:$0xff]  ;;  %v4773_v40 = vld [vmem:[#allocation27_spill] sm:$0xff] }
 0x259   :  { %2102 = vmatprep.subr.mxu0 %v3627_v41  ;;  %2173 = vmatprep.subr.mxu1 %v3629_v42  ;;  %v4774_v41 = vld [vmem:[#allocation28_spill] sm:$0xff]  ;;  %v4775_v42 = vld [vmem:[#allocation29_spill] sm:$0xff] }
 0x25a   :  { %2103 = vmatpush1.msra.mxu0 %v3633_v43  ;;  %2174 = vmatpush1.msra.mxu1 %v3635_v44  ;;  %v4776_v43 = vld [vmem:[#allocation30_spill] sm:$0xff]  ;;  %v4777_v44 = vld [vmem:[#allocation31_spill] sm:$0xff] }
 0x25b   :  { %2104 = vmatprep.subr.mxu0 %v3639_v45  ;;  %2175 = vmatprep.subr.mxu1 %v3641_v46  ;;  %v4778_v45 = vld [vmem:[#allocation32_spill] sm:$0xff]  ;;  %v4779_v46 = vld [vmem:[#allocation33_spill] sm:$0xff] }
 0x25c   :  { %2105 = vmatpush1.msra.mxu0 %v3645_v47  ;;  %2176 = vmatpush1.msra.mxu1 %v3647_v48  ;;  %v4780_v47 = vld [vmem:[#allocation34_spill] sm:$0xff]  ;;  %v4781_v48 = vld [vmem:[#allocation35_spill] sm:$0xff] }
 0x25d   :  { %2106 = vmatprep.subr.mxu0 %v3651_v49  ;;  %2177 = vmatprep.subr.mxu1 %v3653_v50  ;;  %v4782_v49 = vld [vmem:[#allocation36_spill] sm:$0xff]  ;;  %v4783_v50 = vmov 0.0  }
 0x25e   :  { %2107 = vmatpush1.msra.mxu0 %v3657_v51  ;;  %2178 = vmatpush1.msra.mxu1 %v3659_v52  ;;  %v4784_v51 = vld [vmem:[#allocation37_spill] sm:$0xff] }
 0x25f   :  { %2108 = vmatprep.subr.mxu0 %v3663_v53  ;;  %2179 = vmatprep.subr.mxu1 %v3665_v54  ;;  %v4118_v52 = vld [vmem:[#allocation3 + $0x1e8] sm:$0xff]  ;;  %v4121_v53 = vld [vmem:[#allocation3 + $0x1f8] sm:$0xff] }
 0x260   :  { %2109 = vmatpush1.msra.mxu0 %v3669_v55  ;;  %2180 = vmatpush1.msra.mxu1 %v3671_v56  ;;  %4785 = vst [vmem:[#allocation11_spill] sm:$0xff] %v4118_v52  ;;  %4786 = vst [vmem:[#allocation12_spill] sm:$0xff] %v4121_v53 }
 0x261   :  { %2110 = vmatprep.subr.mxu0 %v3675_v57  ;;  %2181 = vmatprep.subr.mxu1 %v3677_v58 }
 0x262   :  { %2111 = vmatpush1.msra.mxu0 %v3681_v59  ;;  %2182 = vmatpush1.msra.mxu1 %v3683_v60 }
 0x263   :  { %2112 = vmatprep.subr.mxu0 %v3687_v61  ;;  %2183 = vmatprep.subr.mxu1 %v3689_v62 }
 0x264   :  { %2113 = vmatpush1.msra.mxu0 %v3693_v63  ;;  %2184 = vmatpush1.msra.mxu1 %v3695_v1  ;;  %v4787_v63 = vld [vmem:[#allocation40_spill] sm:$0xff]  ;;  %v4788_v1 = vld [vmem:[#allocation41_spill] sm:$0xff] }
 0x265   :  { %2114 = vmatprep.subr.mxu0 %v3699_v2  ;;  %2185 = vmatprep.subr.mxu1 %v4731_v21  ;;  %v4789_v2 = vcombine.low %v4787_v63, %v4788_v1  ;;  %v4238_v63 = vld [vmem:[#allocation3 + $0xd8] sm:$0xff]  ;;  %v4241_v1 = vld [vmem:[#allocation3 + $0xc0] sm:$0xff] }
 0x266   :  { %2115 = vmatpush1.msra.mxu0 %v4732_v26  ;;  %2186 = vmatpush1.msra.mxu1 %v4733_v30 }
 0x267   :  { %2116 = vmatprep.subr.mxu0 %v4734_v23  ;;  %2187 = vmatprep.subr.mxu1 %v4735_v6 }
 0x268   :  { %2117 = vmatpush1.msra.mxu0 %v4736_v24  ;;  %2188 = vmatpush1.msra.mxu1 %v4737_v8 }
 0x269   :  { %2118 = vmatprep.subr.mxu0 %v4764_v31  ;;  %2189 = vmatprep.subr.mxu1 %v4765_v32  ;;  %v4151_v31 = vld [vmem:[#allocation3 + $0x1a8] sm:$0xff]  ;;  %v4154_v32 = vld [vmem:[#allocation3 + $0x1b8] sm:$0xff] }
 0x26a   :  { %2119 = vmatpush1.msra.mxu0 %v4766_v33  ;;  %2190 = vmatpush1.msra.mxu1 %v4767_v34  ;;  %v4157_v33 = vld [vmem:[#allocation3 + $0x1a0] sm:$0xff]  ;;  %v4160_v34 = vld [vmem:[#allocation3 + $0x1b0] sm:$0xff] }
 0x26b   :  { %2120 = vmatprep.subr.mxu0 %v4768_v35  ;;  %2191 = vmatprep.subr.mxu1 %v4769_v36  ;;  %v4163_v35 = vld [vmem:[#allocation3 + $0x188] sm:$0xff]  ;;  %v4166_v36 = vld [vmem:[#allocation3 + $0x198] sm:$0xff] }
 0x26c   :  { %2121 = vmatpush1.msra.mxu0 %v4770_v37  ;;  %2192 = vmatpush1.msra.mxu1 %v4771_v38  ;;  %v4169_v37 = vld [vmem:[#allocation3 + $0x180] sm:$0xff]  ;;  %v4172_v38 = vld [vmem:[#allocation3 + $0x190] sm:$0xff] }
 0x26d   :  { %2122 = vmatprep.subr.mxu0 %v4772_v39  ;;  %2193 = vmatprep.subr.mxu1 %v4773_v40  ;;  %v4175_v39 = vld [vmem:[#allocation3 + $0x168] sm:$0xff]  ;;  %v4178_v40 = vld [vmem:[#allocation3 + $0x178] sm:$0xff] }
 0x26e   :  { %2123 = vmatpush1.msra.mxu0 %v4774_v41  ;;  %2194 = vmatpush1.msra.mxu1 %v4775_v42  ;;  %v4181_v41 = vld [vmem:[#allocation3 + $0x160] sm:$0xff]  ;;  %v4184_v42 = vld [vmem:[#allocation3 + $0x170] sm:$0xff] }
 0x26f   :  { %2124 = vmatprep.subr.mxu0 %v4776_v43  ;;  %2195 = vmatprep.subr.mxu1 %v4777_v44  ;;  %v4187_v43 = vld [vmem:[#allocation3 + $0x148] sm:$0xff]  ;;  %v4190_v44 = vld [vmem:[#allocation3 + $0x158] sm:$0xff] }
 0x270   :  { %2125 = vmatpush1.msra.mxu0 %v4778_v45  ;;  %2196 = vmatpush1.msra.mxu1 %v4779_v46  ;;  %v4193_v45 = vld [vmem:[#allocation3 + $0x140] sm:$0xff]  ;;  %v4196_v46 = vld [vmem:[#allocation3 + $0x150] sm:$0xff] }
 0x271   :  { %2126 = vmatprep.subr.mxu0 %v4780_v47  ;;  %2197 = vmatprep.subr.mxu1 %v4781_v48  ;;  %v4199_v47 = vld [vmem:[#allocation3 + $0x128] sm:$0xff]  ;;  %v4202_v48 = vld [vmem:[#allocation3 + $0x138] sm:$0xff] }
 0x272   :  { %2127 = vmatpush1.msra.mxu0 %v4782_v49  ;;  %2160 = vmatprep.mubr.f32.mxu0 %v4783_v50  ;;  %v4205_v49 = vld [vmem:[#allocation3 + $0x120] sm:$0xff] }
 0x273   :  { %2198 = vmatpush1.msra.mxu1 %v4784_v51  ;;  %2231 = vmatprep.mubr.f32.mxu1 %v4783_v50  ;;  %v4208_v51 = vld [vmem:[#allocation3 + $0x130] sm:$0xff] }
 0x274   :  { %2293 = vmatprep.subr.mxu0 %v4118_v52  ;;  %2364 = vmatprep.subr.mxu1 %v4121_v53 }
 0x313   :  { %v1965_v54 = vpop.f32.mrf.mxu0  ;;  %v2036_v55 = vpop.f32.mrf.mxu1 }
 0x315   :  { %v1967_v56 = vpop.f32.mrf.mxu0  ;;  %v2038_v57 = vpop.f32.mrf.mxu1 }
 0x316   :  { %v2045_v58 = vcombine.low %v1965_v54, %v1967_v56  ;;  %v2046_v59 = vcombine.low %v2036_v55, %v2038_v57  ;;  %v4211_v54 = vld [vmem:[#allocation3 + $0x108] sm:$0xff]  ;;  %v4214_v55 = vld [vmem:[#allocation3 + $0x118] sm:$0xff]  ;;  %v4217_v56 = vld [vmem:[#allocation3 + $0x100] sm:$0xff] }
 0x317   :  { %v4220_v57 = vld [vmem:[#allocation3 + $0x110] sm:$0xff] }
 0x318   :  { %v2053_v60 = vrot.slane %v2045_v58, %v3882_v7  ;;  %v2060_v61 = vrot.slane %v2046_v59, %v3882_v7  ;;  %v4223_v58 = vld [vmem:[#allocation3 + $0xe8] sm:$0xff]  ;;  %v4226_v59 = vld [vmem:[#allocation3 + $0xf8] sm:$0xff] }
 0x31a   :  { %v2061_v62 = vcombine.low %v2053_v60, %v2060_v61  ;;  %v4229_v60 = vld [vmem:[#allocation3 + $0xe0] sm:$0xff]  ;;  %v4232_v61 = vld [vmem:[#allocation3 + $0xf0] sm:$0xff] }
 0x31c   :  { %v2063_v28 = vadd.f32 %v2061_v62, %v4789_v2  ;;  %v4235_v62 = vld [vmem:[#allocation3 + $0xc8] sm:$0xff]  ;;  %v4244_v2 = vld [vmem:[#allocation3 + $0xd0] sm:$0xff] }
 0x31e   :  { %v3151_v21 = vmul.f32 -1.442695, %v2063_v28  ;;  %v2071_v26 = vrot.slane %v2063_v28, 2  ;;  %v2082_v23 = vrot.slane %v2063_v28, 6  ;;  %v2079_v8 = vrot.slane %v2063_v28, 4  ;;  %v4247_v28 = vld [vmem:[#allocation3 + $0xa8] sm:$0xff] }
 0x320   :  { %3209 = vpow2.f32 %v3151_v21  ;;  %v3152_v30 = vmul.f32 -1.442695, %v2071_v26  ;;  %v3153_v6 = vmul.f32 -1.442695, %v2082_v23  ;;  %v4250_v21 = vld [vmem:[#allocation3 + $0xb8] sm:$0xff]  ;;  %v4253_v26 = vld [vmem:[#allocation3 + $0xa0] sm:$0xff] }
 0x321   :  { %v4259_v23 = vld [vmem:[#allocation3 + $0x88] sm:$0xff] }
 0x322   :  { %3211 = vpow2.f32 %v3152_v30  ;;  %v4256_v30 = vld [vmem:[#allocation3 + $0xb0] sm:$0xff]  ;;  %4790 = vst [vmem:[#allocation13_spill] sm:$0xff] %v4259_v23 }
 0x323   :  { %3213 = vpow2.f32 %v3153_v6  ;;  %v4262_v6 = vld [vmem:[#allocation3 + $0x98] sm:$0xff] }
 0x324   :  { %4791 = vst [vmem:[#allocation14_spill] sm:$0xff] %v4262_v6 }
 0x32d   :  { %v3210_v24 = vpop.eup %3209 }
 0x32e   :  { %v2067_v5 = vadd.f32 1.0, %v3210_v24  ;;  %v4265_v24 = vld [vmem:[#allocation3 + $0x80] sm:$0xff] }
 0x32f   :  { %v3212_v15 = vpop.eup %3211  ;;  %4792 = vst [vmem:[#allocation15_spill] sm:$0xff] %v4265_v24 }
 0x330   :  { %3215 = vrcp.f32 %v2067_v5  ;;  %v2076_v18 = vadd.f32 1.0, %v3212_v15  ;;  %v3214_v29 = vpop.eup %3213  ;;  %v4271_v5 = vld [vmem:[#allocation3 + $0x68] sm:$0xff]  ;;  %v4274_v15 = vld [vmem:[#allocation3 + $0x78] sm:$0xff] }
 0x331   :  { %3217 = vtanh.f32 %v2079_v8  ;;  %v2087_v16 = vadd.f32 1.0, %v3214_v29  ;;  %v4268_v8 = vld [vmem:[#allocation3 + $0x90] sm:$0xff]  ;;  %4794 = vst [vmem:[#allocation17_spill] sm:$0xff] %v4271_v5  ;;  %4795 = vst [vmem:[#allocation9_spill] sm:$0xff] %v4274_v15 }
 0x332   :  { %3219 = vrcp.f32 %v2076_v18  ;;  %4793 = vst [vmem:[#allocation16_spill] sm:$0xff] %v4268_v8  ;;  %v4277_v18 = vld [vmem:[#allocation3 + $0x60] sm:$0xff]  ;;  %v4280_v29 = vld [vmem:[#allocation3 + $0x70] sm:$0xff] }
 0x333   :  { %3221 = vrcp.f32 %v2087_v16  ;;  %4796 = vst [vmem:[#allocation10_spill] sm:$0xff] %v4277_v18  ;;  %4797 = vst [vmem:[#allocation38_spill] sm:$0xff] %v4280_v29  ;;  %v4292_v16 = vld [vmem:[#allocation3 + $0x50] sm:$0xff] }
 0x334   :  { %4801 = vst [vmem:[#allocation20_spill] sm:$0xff] %v4292_v16 }
 0x33d   :  { %v3216_v27 = vpop.eup %3215 }
 0x33e   :  { %v3218_v14 = vpop.eup %3217 }
 0x33f   :  { %v3220_v19 = vpop.eup %3219  ;;  %v2091_v11 = vmul.f32 %v3218_v14, %v3216_v27  ;;  %v4283_v27 = vld [vmem:[#allocation3 + $0x48] sm:$0xff]  ;;  %v4286_v14 = vld [vmem:[#allocation3 + $0x58] sm:$0xff] }
 0x340   :  { %v2090_v12 = vmul.f32 %v3220_v19, %v4051_v20  ;;  %v3222_v17 = vpop.eup %3221  ;;  %v4139_v20 = vld [vmem:[#allocation3 + $0x1c8] sm:$0xff]  ;;  %4798 = vst [vmem:[#allocation39_spill] sm:$0xff] %v4283_v27  ;;  %4799 = vst [vmem:[#allocation18_spill] sm:$0xff] %v4286_v14  ;;  %v4289_v19 = vld [vmem:[#allocation3 + $0x40] sm:$0xff] }
 0x341   :  { %4800 = vst [vmem:[#allocation19_spill] sm:$0xff] %v4289_v19 }
 0x342   :  { %v4130_v0 = vadd.f32 %v2091_v11, %v2090_v12  ;;  %v4295_v12 = vld [vmem:[#allocation3 + $0x28] sm:$0xff]  ;;  %v4298_v11 = vld [vmem:[#allocation3 + $0x38] sm:$0xff] }
 0x343   :  { %4802 = vst [vmem:[#allocation21_spill] sm:$0xff] %v4295_v12  ;;  %4803 = vst [vmem:[#allocation22_spill] sm:$0xff] %v4298_v11 }
 0x344   :  { %3223 = vtanh.f32 %v4130_v0 }
 0x351   :  { %v3224_v25 = vpop.eup %3223 }
 0x352   :  { %v2094_v22 = vmul.f32 %v3224_v25, %v3222_v17  ;;  %v4301_v17 = vld [vmem:[#allocation3 + $0x20] sm:$0xff]  ;;  %v4304_v25 = vld [vmem:[#allocation3 + $0x30] sm:$0xff] }
 0x353   :  { %4804 = vst [vmem:[#allocation23_spill] sm:$0xff] %v4301_v17  ;;  %4805 = vst [vmem:[#allocation24_spill] sm:$0xff] %v4304_v25 }
 0x354   :  { %2161 = vmatmul.mubr.f32.vlgmr.msra.gmra.mxu0 %v2094_v22  ;;  %2232 = vmatmul.mubr.f32.vlgmr.msra.gmra.mxu1 %v2094_v22  ;;  %v4307_v22 = vld [vmem:[#allocation3 + $0x8] sm:$0xff] }
 0x355   :  { %2294 = vmatpush1.msra.mxu0 %v4133_v13  ;;  %2365 = vmatpush1.msra.mxu1 %v4136_v10  ;;  %4806 = vst [vmem:[#allocation25_spill] sm:$0xff] %v4307_v22 }
 0x356   :  { %2295 = vmatprep.subr.mxu0 %v4139_v20  ;;  %2366 = vmatprep.subr.mxu1 %v4142_v9 }
 0x357   :  { %2296 = vmatpush1.msra.mxu0 %v4145_v3  ;;  %2367 = vmatpush1.msra.mxu1 %v4148_v4 }
 0x358   :  { %2297 = vmatprep.subr.mxu0 %v4151_v31  ;;  %2368 = vmatprep.subr.mxu1 %v4154_v32 }
 0x359   :  { %2298 = vmatpush1.msra.mxu0 %v4157_v33  ;;  %2369 = vmatpush1.msra.mxu1 %v4160_v34 }
 0x35a   :  { %2299 = vmatprep.subr.mxu0 %v4163_v35  ;;  %2370 = vmatprep.subr.mxu1 %v4166_v36 }
 0x35b   :  { %2300 = vmatpush1.msra.mxu0 %v4169_v37  ;;  %2371 = vmatpush1.msra.mxu1 %v4172_v38 }
 0x35c   :  { %2301 = vmatprep.subr.mxu0 %v4175_v39  ;;  %2372 = vmatprep.subr.mxu1 %v4178_v40 }
 0x35d   :  { %2302 = vmatpush1.msra.mxu0 %v4181_v41  ;;  %2373 = vmatpush1.msra.mxu1 %v4184_v42 }
 0x35e   :  { %2303 = vmatprep.subr.mxu0 %v4187_v43  ;;  %2374 = vmatprep.subr.mxu1 %v4190_v44 }
 0x35f   :  { %2304 = vmatpush1.msra.mxu0 %v4193_v45  ;;  %2375 = vmatpush1.msra.mxu1 %v4196_v46 }
 0x360   :  { %2305 = vmatprep.subr.mxu0 %v4199_v47  ;;  %2376 = vmatprep.subr.mxu1 %v4202_v48 }
 0x361   :  { %2306 = vmatpush1.msra.mxu0 %v4205_v49  ;;  %2377 = vmatpush1.msra.mxu1 %v4208_v51 }
 0x362   :  { %2307 = vmatprep.subr.mxu0 %v4211_v54  ;;  %2378 = vmatprep.subr.mxu1 %v4214_v55 }
 0x363   :  { %2308 = vmatpush1.msra.mxu0 %v4217_v56  ;;  %2379 = vmatpush1.msra.mxu1 %v4220_v57 }
 0x364   :  { %2309 = vmatprep.subr.mxu0 %v4223_v58  ;;  %2380 = vmatprep.subr.mxu1 %v4226_v59 }
 0x365   :  { %2310 = vmatpush1.msra.mxu0 %v4229_v60  ;;  %2381 = vmatpush1.msra.mxu1 %v4232_v61 }
 0x366   :  { %2311 = vmatprep.subr.mxu0 %v4235_v62  ;;  %2382 = vmatprep.subr.mxu1 %v4238_v63 }
 0x367   :  { %2312 = vmatpush1.msra.mxu0 %v4241_v1  ;;  %2383 = vmatpush1.msra.mxu1 %v4244_v2 }
 0x368   :  { %2313 = vmatprep.subr.mxu0 %v4247_v28  ;;  %2384 = vmatprep.subr.mxu1 %v4250_v21 }
 0x369   :  { %2314 = vmatpush1.msra.mxu0 %v4253_v26  ;;  %2385 = vmatpush1.msra.mxu1 %v4256_v30 }
 0x36a   :  { %2315 = vmatprep.subr.mxu0 %v4259_v23  ;;  %2386 = vmatprep.subr.mxu1 %v4262_v6 }
 0x36b   :  { %2316 = vmatpush1.msra.mxu0 %v4265_v24  ;;  %2387 = vmatpush1.msra.mxu1 %v4268_v8 }
 0x36c   :  { %2317 = vmatprep.subr.mxu0 %v4271_v5  ;;  %2388 = vmatprep.subr.mxu1 %v4274_v15  ;;  %v4811_v15 = vld [vmem:[#allocation43_spill] sm:$0xff] }
 0x36d   :  { %2318 = vmatpush1.msra.mxu0 %v4277_v18  ;;  %2389 = vmatpush1.msra.mxu1 %v4280_v29  ;;  %v4810_v18 = vld [vmem:[#allocation42_spill] sm:$0xff] }
 0x36e   :  { %2319 = vmatprep.subr.mxu0 %v4283_v27  ;;  %2390 = vmatprep.subr.mxu1 %v4286_v14 }
 0x36f   :  { %2320 = vmatpush1.msra.mxu0 %v4289_v19  ;;  %2391 = vmatpush1.msra.mxu1 %v4292_v16  ;;  %v4310_v16 = vld [vmem:[#allocation3 + $0x18] sm:$0xff] }
 0x370   :  { %2321 = vmatprep.subr.mxu0 %v4295_v12  ;;  %2392 = vmatprep.subr.mxu1 %v4298_v11  ;;  %4807 = vst [vmem:[#allocation26_spill] sm:$0xff] %v4310_v16  ;;  %v4313_v12 = vld [vmem:[#allocation3] sm:$0xff]  ;;  %v4317_v11 = vld [vmem:[#allocation3 + $0x10] sm:$0xff] }
 0x371   :  { %2322 = vmatpush1.msra.mxu0 %v4301_v17  ;;  %2393 = vmatpush1.msra.mxu1 %v4304_v25  ;;  %4808 = vst [vmem:[#allocation27_spill] sm:$0xff] %v4313_v12  ;;  %4809 = vst [vmem:[#allocation28_spill] sm:$0xff] %v4317_v11 }
 0x372   :  { %2323 = vmatprep.subr.mxu0 %v4307_v22  ;;  %2394 = vmatprep.subr.mxu1 %v4310_v16 }
 0x373   :  { %2324 = vmatpush1.msra.mxu0 %v4313_v12  ;;  %2357 = vmatprep.mubr.f32.mxu0 %v4783_v50 }
 0x374   :  { %2395 = vmatpush1.msra.mxu1 %v4317_v11  ;;  %2428 = vmatprep.mubr.f32.mxu1 %v4783_v50  ;;  %v4812_v11 = vcombine.low %v4810_v18, %v4811_v15 }
 0x375   :  { %2490 = vmatprep.subr.mxu0 %v4118_v52  ;;  %2561 = vmatprep.subr.mxu1 %v4121_v53 }
 0x414   :  { %v2162_v22 = vpop.f32.mrf.mxu0  ;;  %v2233_v25 = vpop.f32.mrf.mxu1 }
 0x416   :  { %v2164_v17 = vpop.f32.mrf.mxu0  ;;  %v2235_v16 = vpop.f32.mrf.mxu1 }
 0x417   :  { %v2242_v19 = vcombine.low %v2162_v22, %v2164_v17  ;;  %v2243_v14 = vcombine.low %v2233_v25, %v2235_v16  ;;  %v4818_v25 = vld [vmem:[#allocation9_spill] sm:$0xff]  ;;  %v4819_v22 = vld [vmem:[#allocation10_spill] sm:$0xff] }
 0x419   :  { %v2250_v12 = vrot.slane %v2242_v19, %v3882_v7  ;;  %v2257_v27 = vrot.slane %v2243_v14, %v3882_v7 }
 0x41b   :  { %v2258_v29 = vcombine.low %v2250_v12, %v2257_v27  ;;  %v4816_v12 = vld [vmem:[#allocation16_spill] sm:$0xff] }
 0x41d   :  { %v2260_v5 = vadd.f32 %v2258_v29, %v4812_v11  ;;  %v4817_v11 = vld [vmem:[#allocation17_spill] sm:$0xff] }
 0x41f   :  { %v3154_v50 = vmul.f32 -1.442695, %v2260_v5  ;;  %v2268_v8 = vrot.slane %v2260_v5, 2  ;;  %v2279_v53 = vrot.slane %v2260_v5, 6  ;;  %v2276_v23 = vrot.slane %v2260_v5, 4  ;;  %v4815_v5 = vld [vmem:[#allocation15_spill] sm:$0xff] }
 0x421   :  { %3225 = vpow2.f32 %v3154_v50  ;;  %v3155_v52 = vmul.f32 -1.442695, %v2268_v8  ;;  %v3156_v24 = vmul.f32 -1.442695, %v2279_v53 }
 0x423   :  { %3227 = vpow2.f32 %v3155_v52 }
 0x424   :  { %3229 = vpow2.f32 %v3156_v24 }
 0x42e   :  { %v3226_v6 = vpop.eup %3225 }
 0x42f   :  { %v2264_v17 = vadd.f32 1.0, %v3226_v6 }
 0x430   :  { %v3228_v16 = vpop.eup %3227 }
 0x431   :  { %3231 = vrcp.f32 %v2264_v17  ;;  %v2273_v19 = vadd.f32 1.0, %v3228_v16  ;;  %v3230_v27 = vpop.eup %3229  ;;  %v4820_v17 = vld [vmem:[#allocation38_spill] sm:$0xff]  ;;  %v4821_v16 = vld [vmem:[#allocation39_spill] sm:$0xff] }
 0x432   :  { %3233 = vtanh.f32 %v2276_v23  ;;  %v2284_v29 = vadd.f32 1.0, %v3230_v27  ;;  %v4814_v23 = vld [vmem:[#allocation14_spill] sm:$0xff]  ;;  %v4823_v27 = vld [vmem:[#allocation19_spill] sm:$0xff] }
 0x433   :  { %3235 = vrcp.f32 %v2273_v19  ;;  %v4822_v19 = vld [vmem:[#allocation18_spill] sm:$0xff] }
 0x434   :  { %3237 = vrcp.f32 %v2284_v29  ;;  %v4827_v29 = vld [vmem:[#allocation23_spill] sm:$0xff] }
 0x43e   :  { %v3232_v14 = vpop.eup %3231 }
 0x43f   :  { %v3234_v15 = vpop.eup %3233 }
 0x440   :  { %v3236_v18 = vpop.eup %3235  ;;  %v2288_v8 = vmul.f32 %v3234_v15, %v3232_v14  ;;  %v4824_v14 = vld [vmem:[#allocation20_spill] sm:$0xff]  ;;  %v4825_v15 = vld [vmem:[#allocation21_spill] sm:$0xff] }
 0x441   :  { %v2287_v50 = vmul.f32 %v3236_v18, %v4130_v0  ;;  %v3238_v53 = vpop.eup %3237  ;;  %v4813_v0 = vld [vmem:[#allocation13_spill] sm:$0xff]  ;;  %v4826_v18 = vld [vmem:[#allocation22_spill] sm:$0xff] }
 0x443   :  { %v4329_v52 = vadd.f32 %v2288_v8, %v2287_v50  ;;  %v4828_v50 = vld [vmem:[#allocation24_spill] sm:$0xff]  ;;  %v4829_v8 = vld [vmem:[#allocation25_spill] sm:$0xff] }
 0x445   :  { %3239 = vtanh.f32 %v4329_v52 }
 0x452   :  { %v3240_v6 = vpop.eup %3239 }
 0x453   :  { %v2291_v24 = vmul.f32 %v3240_v6, %v3238_v53  ;;  %v4830_v53 = vld [vmem:[#allocation26_spill] sm:$0xff]  ;;  %v4831_v6 = vld [vmem:[#allocation27_spill] sm:$0xff] }
 0x455   :  { %2358 = vmatmul.mubr.f32.vlgmr.msra.gmra.mxu0 %v2291_v24  ;;  %2429 = vmatmul.mubr.f32.vlgmr.msra.gmra.mxu1 %v2291_v24  ;;  %v4832_v24 = vmov 0.0  }
 0x456   :  { %2491 = vmatpush1.msra.mxu0 %v4133_v13  ;;  %2562 = vmatpush1.msra.mxu1 %v4136_v10 }
 0x457   :  { %2492 = vmatprep.subr.mxu0 %v4139_v20  ;;  %2563 = vmatprep.subr.mxu1 %v4142_v9 }
 0x458   :  { %2493 = vmatpush1.msra.mxu0 %v4145_v3  ;;  %2564 = vmatpush1.msra.mxu1 %v4148_v4 }
 0x459   :  { %2494 = vmatprep.subr.mxu0 %v4151_v31  ;;  %2565 = vmatprep.subr.mxu1 %v4154_v32 }
 0x45a   :  { %2495 = vmatpush1.msra.mxu0 %v4157_v33  ;;  %2566 = vmatpush1.msra.mxu1 %v4160_v34 }
 0x45b   :  { %2496 = vmatprep.subr.mxu0 %v4163_v35  ;;  %2567 = vmatprep.subr.mxu1 %v4166_v36 }
 0x45c   :  { %2497 = vmatpush1.msra.mxu0 %v4169_v37  ;;  %2568 = vmatpush1.msra.mxu1 %v4172_v38 }
 0x45d   :  { %2498 = vmatprep.subr.mxu0 %v4175_v39  ;;  %2569 = vmatprep.subr.mxu1 %v4178_v40 }
 0x45e   :  { %2499 = vmatpush1.msra.mxu0 %v4181_v41  ;;  %2570 = vmatpush1.msra.mxu1 %v4184_v42 }
 0x45f   :  { %2500 = vmatprep.subr.mxu0 %v4187_v43  ;;  %2571 = vmatprep.subr.mxu1 %v4190_v44 }
 0x460   :  { %2501 = vmatpush1.msra.mxu0 %v4193_v45  ;;  %2572 = vmatpush1.msra.mxu1 %v4196_v46 }
 0x461   :  { %2502 = vmatprep.subr.mxu0 %v4199_v47  ;;  %2573 = vmatprep.subr.mxu1 %v4202_v48 }
 0x462   :  { %2503 = vmatpush1.msra.mxu0 %v4205_v49  ;;  %2574 = vmatpush1.msra.mxu1 %v4208_v51 }
 0x463   :  { %2504 = vmatprep.subr.mxu0 %v4211_v54  ;;  %2575 = vmatprep.subr.mxu1 %v4214_v55 }
 0x464   :  { %2505 = vmatpush1.msra.mxu0 %v4217_v56  ;;  %2576 = vmatpush1.msra.mxu1 %v4220_v57 }
 0x465   :  { %2506 = vmatprep.subr.mxu0 %v4223_v58  ;;  %2577 = vmatprep.subr.mxu1 %v4226_v59 }
 0x466   :  { %2507 = vmatpush1.msra.mxu0 %v4229_v60  ;;  %2578 = vmatpush1.msra.mxu1 %v4232_v61 }
 0x467   :  { %2508 = vmatprep.subr.mxu0 %v4235_v62  ;;  %2579 = vmatprep.subr.mxu1 %v4238_v63 }
 0x468   :  { %2509 = vmatpush1.msra.mxu0 %v4241_v1  ;;  %2580 = vmatpush1.msra.mxu1 %v4244_v2 }
 0x469   :  { %2510 = vmatprep.subr.mxu0 %v4247_v28  ;;  %2581 = vmatprep.subr.mxu1 %v4250_v21 }
 0x46a   :  { %2511 = vmatpush1.msra.mxu0 %v4253_v26  ;;  %2582 = vmatpush1.msra.mxu1 %v4256_v30 }
 0x46b   :  { %2512 = vmatprep.subr.mxu0 %v4813_v0  ;;  %2583 = vmatprep.subr.mxu1 %v4814_v23 }
 0x46c   :  { %2513 = vmatpush1.msra.mxu0 %v4815_v5  ;;  %2584 = vmatpush1.msra.mxu1 %v4816_v12 }
 0x46d   :  { %2514 = vmatprep.subr.mxu0 %v4817_v11  ;;  %2585 = vmatprep.subr.mxu1 %v4818_v25  ;;  %v4837_v25 = vld [vmem:[#allocation45_spill] sm:$0xff] }
 0x46e   :  { %2515 = vmatpush1.msra.mxu0 %v4819_v22  ;;  %2586 = vmatpush1.msra.mxu1 %v4820_v17  ;;  %v4836_v22 = vld [vmem:[#allocation44_spill] sm:$0xff] }
 0x46f   :  { %2516 = vmatprep.subr.mxu0 %v4821_v16  ;;  %2587 = vmatprep.subr.mxu1 %v4822_v19  ;;  %v4833_v19 = vld [vmem:[#allocation28_spill] sm:$0xff] }
 0x470   :  { %2517 = vmatpush1.msra.mxu0 %v4823_v27  ;;  %2588 = vmatpush1.msra.mxu1 %v4824_v14  ;;  %v4834_v14 = vld [vmem:[#allocation11_spill] sm:$0xff] }
 0x471   :  { %2518 = vmatprep.subr.mxu0 %v4825_v15  ;;  %2589 = vmatprep.subr.mxu1 %v4826_v18  ;;  %v4835_v15 = vld [vmem:[#allocation12_spill] sm:$0xff] }
 0x472   :  { %2519 = vmatpush1.msra.mxu0 %v4827_v29  ;;  %2590 = vmatpush1.msra.mxu1 %v4828_v50 }
 0x473   :  { %2520 = vmatprep.subr.mxu0 %v4829_v8  ;;  %2591 = vmatprep.subr.mxu1 %v4830_v53 }
 0x474   :  { %2521 = vmatpush1.msra.mxu0 %v4831_v6  ;;  %2554 = vmatprep.mubr.f32.mxu0 %v4832_v24 }
 0x475   :  { %2592 = vmatpush1.msra.mxu1 %v4833_v19  ;;  %2625 = vmatprep.mubr.f32.mxu1 %v4832_v24  ;;  %v4838_v19 = vcombine.low %v4836_v22, %v4837_v25 }
 0x476   :  { %2687 = vmatprep.subr.mxu0 %v4834_v14  ;;  %2758 = vmatprep.subr.mxu1 %v4835_v15 }
 0x515   :  { %v2359_v18 = vpop.f32.mrf.mxu0  ;;  %v2430_v29 = vpop.f32.mrf.mxu1 }
 0x517   :  { %v2361_v27 = vpop.f32.mrf.mxu0  ;;  %v2432_v50 = vpop.f32.mrf.mxu1 }
 0x518   :  { %v2439_v16 = vcombine.low %v2359_v18, %v2361_v27  ;;  %v2440_v8 = vcombine.low %v2430_v29, %v2432_v50 }
 0x51a   :  { %v2447_v53 = vrot.slane %v2439_v16, %v3882_v7  ;;  %v2454_v6 = vrot.slane %v2440_v8, %v3882_v7  ;;  %v4842_v8 = vld [vmem:[#allocation16_spill] sm:$0xff] }
 0x51c   :  { %v2455_v17 = vcombine.low %v2447_v53, %v2454_v6  ;;  %v4843_v53 = vld [vmem:[#allocation17_spill] sm:$0xff] }
 0x51d   :  { %v4844_v6 = vld [vmem:[#allocation9_spill] sm:$0xff] }
 0x51e   :  { %v2457_v11 = vadd.f32 %v2455_v17, %v4838_v19 }
 0x520   :  { %v3157_v24 = vmul.f32 -1.442695, %v2457_v11  ;;  %v2465_v12 = vrot.slane %v2457_v11, 2  ;;  %v2476_v15 = vrot.slane %v2457_v11, 6  ;;  %v2473_v0 = vrot.slane %v2457_v11, 4 }
 0x522   :  { %3241 = vpow2.f32 %v3157_v24  ;;  %v3158_v14 = vmul.f32 -1.442695, %v2465_v12  ;;  %v3159_v5 = vmul.f32 -1.442695, %v2476_v15  ;;  %v4841_v15 = vld [vmem:[#allocation15_spill] sm:$0xff]  ;;  %v4845_v24 = vld [vmem:[#allocation10_spill] sm:$0xff] }
 0x524   :  { %3243 = vpow2.f32 %v3158_v14 }
 0x525   :  { %3245 = vpow2.f32 %v3159_v5 }
 0x52f   :  { %v3242_v23 = vpop.eup %3241 }
 0x530   :  { %v2461_v27 = vadd.f32 1.0, %v3242_v23 }
 0x531   :  { %v3244_v18 = vpop.eup %3243 }
 0x532   :  { %3247 = vrcp.f32 %v2461_v27  ;;  %v2470_v16 = vadd.f32 1.0, %v3244_v18  ;;  %v3246_v29 = vpop.eup %3245  ;;  %v4846_v27 = vld [vmem:[#allocation38_spill] sm:$0xff]  ;;  %v4847_v18 = vld [vmem:[#allocation39_spill] sm:$0xff] }
 0x533   :  { %3249 = vtanh.f32 %v2473_v0  ;;  %v2481_v17 = vadd.f32 1.0, %v3246_v29  ;;  %v4840_v0 = vld [vmem:[#allocation14_spill] sm:$0xff]  ;;  %v4849_v29 = vld [vmem:[#allocation19_spill] sm:$0xff] }
 0x534   :  { %3251 = vrcp.f32 %v2470_v16  ;;  %v4848_v16 = vld [vmem:[#allocation18_spill] sm:$0xff] }
 0x535   :  { %3253 = vrcp.f32 %v2481_v17  ;;  %v4853_v17 = vld [vmem:[#allocation23_spill] sm:$0xff] }
 0x53f   :  { %v3248_v50 = vpop.eup %3247 }
 0x540   :  { %v3250_v25 = vpop.eup %3249 }
 0x541   :  { %v3252_v22 = vpop.eup %3251  ;;  %v2485_v12 = vmul.f32 %v3250_v25, %v3248_v50  ;;  %v4850_v50 = vld [vmem:[#allocation20_spill] sm:$0xff]  ;;  %v4851_v25 = vld [vmem:[#allocation21_spill] sm:$0xff] }
 0x542   :  { %v2484_v19 = vmul.f32 %v3252_v22, %v4329_v52  ;;  %v3254_v23 = vpop.eup %3253  ;;  %v4839_v52 = vld [vmem:[#allocation13_spill] sm:$0xff]  ;;  %v4852_v22 = vld [vmem:[#allocation22_spill] sm:$0xff] }
 0x544   :  { %v4404_v14 = vadd.f32 %v2485_v12, %v2484_v19  ;;  %v4854_v19 = vld [vmem:[#allocation24_spill] sm:$0xff]  ;;  %v4855_v12 = vld [vmem:[#allocation25_spill] sm:$0xff] }
 0x546   :  { %3255 = vtanh.f32 %v4404_v14 }
 0x553   :  { %v3256_v11 = vpop.eup %3255 }
 0x554   :  { %v2488_v5 = vmul.f32 %v3256_v11, %v3254_v23  ;;  %v4856_v23 = vld [vmem:[#allocation26_spill] sm:$0xff]  ;;  %v4857_v11 = vld [vmem:[#allocation27_spill] sm:$0xff] }
 0x556   :  { %2555 = vmatmul.mubr.f32.vlgmr.msra.gmra.mxu0 %v2488_v5  ;;  %2626 = vmatmul.mubr.f32.vlgmr.msra.gmra.mxu1 %v2488_v5  ;;  %v4858_v5 = vmov 0.0  }
 0x557   :  { %2688 = vmatpush1.msra.mxu0 %v4133_v13  ;;  %2759 = vmatpush1.msra.mxu1 %v4136_v10 }
 0x558   :  { %2689 = vmatprep.subr.mxu0 %v4139_v20  ;;  %2760 = vmatprep.subr.mxu1 %v4142_v9 }
 0x559   :  { %2690 = vmatpush1.msra.mxu0 %v4145_v3  ;;  %2761 = vmatpush1.msra.mxu1 %v4148_v4 }
 0x55a   :  { %2691 = vmatprep.subr.mxu0 %v4151_v31  ;;  %2762 = vmatprep.subr.mxu1 %v4154_v32 }
 0x55b   :  { %2692 = vmatpush1.msra.mxu0 %v4157_v33  ;;  %2763 = vmatpush1.msra.mxu1 %v4160_v34 }
 0x55c   :  { %2693 = vmatprep.subr.mxu0 %v4163_v35  ;;  %2764 = vmatprep.subr.mxu1 %v4166_v36 }
 0x55d   :  { %2694 = vmatpush1.msra.mxu0 %v4169_v37  ;;  %2765 = vmatpush1.msra.mxu1 %v4172_v38 }
 0x55e   :  { %2695 = vmatprep.subr.mxu0 %v4175_v39  ;;  %2766 = vmatprep.subr.mxu1 %v4178_v40 }
 0x55f   :  { %2696 = vmatpush1.msra.mxu0 %v4181_v41  ;;  %2767 = vmatpush1.msra.mxu1 %v4184_v42 }
 0x560   :  { %2697 = vmatprep.subr.mxu0 %v4187_v43  ;;  %2768 = vmatprep.subr.mxu1 %v4190_v44 }
 0x561   :  { %2698 = vmatpush1.msra.mxu0 %v4193_v45  ;;  %2769 = vmatpush1.msra.mxu1 %v4196_v46 }
 0x562   :  { %2699 = vmatprep.subr.mxu0 %v4199_v47  ;;  %2770 = vmatprep.subr.mxu1 %v4202_v48 }
 0x563   :  { %2700 = vmatpush1.msra.mxu0 %v4205_v49  ;;  %2771 = vmatpush1.msra.mxu1 %v4208_v51 }
 0x564   :  { %2701 = vmatprep.subr.mxu0 %v4211_v54  ;;  %2772 = vmatprep.subr.mxu1 %v4214_v55 }
 0x565   :  { %2702 = vmatpush1.msra.mxu0 %v4217_v56  ;;  %2773 = vmatpush1.msra.mxu1 %v4220_v57 }
 0x566   :  { %2703 = vmatprep.subr.mxu0 %v4223_v58  ;;  %2774 = vmatprep.subr.mxu1 %v4226_v59 }
 0x567   :  { %2704 = vmatpush1.msra.mxu0 %v4229_v60  ;;  %2775 = vmatpush1.msra.mxu1 %v4232_v61 }
 0x568   :  { %2705 = vmatprep.subr.mxu0 %v4235_v62  ;;  %2776 = vmatprep.subr.mxu1 %v4238_v63 }
 0x569   :  { %2706 = vmatpush1.msra.mxu0 %v4241_v1  ;;  %2777 = vmatpush1.msra.mxu1 %v4244_v2 }
 0x56a   :  { %2707 = vmatprep.subr.mxu0 %v4247_v28  ;;  %2778 = vmatprep.subr.mxu1 %v4250_v21 }
 0x56b   :  { %2708 = vmatpush1.msra.mxu0 %v4253_v26  ;;  %2779 = vmatpush1.msra.mxu1 %v4256_v30 }
 0x56c   :  { %2709 = vmatprep.subr.mxu0 %v4839_v52  ;;  %2780 = vmatprep.subr.mxu1 %v4840_v0 }
 0x56d   :  { %2710 = vmatpush1.msra.mxu0 %v4841_v15  ;;  %2781 = vmatpush1.msra.mxu1 %v4842_v8 }
 0x56e   :  { %2711 = vmatprep.subr.mxu0 %v4843_v53  ;;  %2782 = vmatprep.subr.mxu1 %v4844_v6  ;;  %v4863_v6 = vld [vmem:[#allocation47_spill] sm:$0xff] }
 0x56f   :  { %2712 = vmatpush1.msra.mxu0 %v4845_v24  ;;  %2783 = vmatpush1.msra.mxu1 %v4846_v27  ;;  %v4862_v24 = vld [vmem:[#allocation46_spill] sm:$0xff] }
 0x570   :  { %2713 = vmatprep.subr.mxu0 %v4847_v18  ;;  %2784 = vmatprep.subr.mxu1 %v4848_v16  ;;  %v4859_v16 = vld [vmem:[#allocation28_spill] sm:$0xff] }
 0x571   :  { %2714 = vmatpush1.msra.mxu0 %v4849_v29  ;;  %2785 = vmatpush1.msra.mxu1 %v4850_v50  ;;  %v4860_v50 = vld [vmem:[#allocation11_spill] sm:$0xff] }
 0x572   :  { %2715 = vmatprep.subr.mxu0 %v4851_v25  ;;  %2786 = vmatprep.subr.mxu1 %v4852_v22  ;;  %v4861_v25 = vld [vmem:[#allocation12_spill] sm:$0xff] }
 0x573   :  { %2716 = vmatpush1.msra.mxu0 %v4853_v17  ;;  %2787 = vmatpush1.msra.mxu1 %v4854_v19 }
 0x574   :  { %2717 = vmatprep.subr.mxu0 %v4855_v12  ;;  %2788 = vmatprep.subr.mxu1 %v4856_v23 }
 0x575   :  { %2718 = vmatpush1.msra.mxu0 %v4857_v11  ;;  %2751 = vmatprep.mubr.f32.mxu0 %v4858_v5 }
 0x576   :  { %2789 = vmatpush1.msra.mxu1 %v4859_v16  ;;  %2822 = vmatprep.mubr.f32.mxu1 %v4858_v5  ;;  %v4864_v16 = vcombine.low %v4862_v24, %v4863_v6 }
 0x577   :  { %2884 = vmatprep.subr.mxu0 %v4860_v50  ;;  %2955 = vmatprep.subr.mxu1 %v4861_v25 }
 0x616   :  { %v2556_v22 = vpop.f32.mrf.mxu0  ;;  %v2627_v17 = vpop.f32.mrf.mxu1 }
 0x618   :  { %v2558_v29 = vpop.f32.mrf.mxu0  ;;  %v2629_v19 = vpop.f32.mrf.mxu1 }
 0x619   :  { %v2636_v18 = vcombine.low %v2556_v22, %v2558_v29  ;;  %v2637_v12 = vcombine.low %v2627_v17, %v2629_v19 }
 0x61b   :  { %v2644_v23 = vrot.slane %v2636_v18, %v3882_v7  ;;  %v2651_v11 = vrot.slane %v2637_v12, %v3882_v7 }
 0x61d   :  { %v2652_v27 = vcombine.low %v2644_v23, %v2651_v11 }
 0x61f   :  { %v2654_v53 = vadd.f32 %v2652_v27, %v4864_v16 }
 0x621   :  { %v3160_v5 = vmul.f32 -1.442695, %v2654_v53  ;;  %v2662_v8 = vrot.slane %v2654_v53, 2  ;;  %v2673_v25 = vrot.slane %v2654_v53, 6  ;;  %v2670_v52 = vrot.slane %v2654_v53, 4 }
 0x623   :  { %3257 = vpow2.f32 %v3160_v5  ;;  %v3161_v50 = vmul.f32 -1.442695, %v2662_v8  ;;  %v3162_v15 = vmul.f32 -1.442695, %v2673_v25 }
 0x625   :  { %3259 = vpow2.f32 %v3161_v50 }
 0x626   :  { %3261 = vpow2.f32 %v3162_v15 }
 0x630   :  { %v3258_v0 = vpop.eup %3257 }
 0x631   :  { %v2658_v29 = vadd.f32 1.0, %v3258_v0 }
 0x632   :  { %v3260_v22 = vpop.eup %3259 }
 0x633   :  { %3263 = vrcp.f32 %v2658_v29  ;;  %v2667_v18 = vadd.f32 1.0, %v3260_v22  ;;  %v3262_v17 = vpop.eup %3261 }
 0x634   :  { %3265 = vtanh.f32 %v2670_v52  ;;  %v2678_v27 = vadd.f32 1.0, %v3262_v17 }
 0x635   :  { %3267 = vrcp.f32 %v2667_v18 }
 0x636   :  { %3269 = vrcp.f32 %v2678_v27 }
 0x640   :  { %v3264_v19 = vpop.eup %3263 }
 0x641   :  { %v3266_v6 = vpop.eup %3265 }
 0x642   :  { %v3268_v24 = vpop.eup %3267  ;;  %v2682_v8 = vmul.f32 %v3266_v6, %v3264_v19 }
 0x643   :  { %v2681_v16 = vmul.f32 %v3268_v24, %v4404_v14  ;;  %v3270_v0 = vpop.eup %3269 }
 0x645   :  { %v4479_v12 = vadd.f32 %v2682_v8, %v2681_v16 }
 0x647   :  { %3271 = vtanh.f32 %v4479_v12 }
 0x654   :  { %v3272_v53 = vpop.eup %3271 }
 0x655   :  { %v2685_v15 = vmul.f32 %v3272_v53, %v3270_v0 }
 0x657   :  { %2752 = vmatmul.mubr.f32.vlgmr.msra.gmra.mxu0 %v2685_v15  ;;  %2823 = vmatmul.mubr.f32.vlgmr.msra.gmra.mxu1 %v2685_v15 }
 0x658   :  { %2885 = vmatpush1.msra.mxu0 %v4133_v13  ;;  %2956 = vmatpush1.msra.mxu1 %v4136_v10  ;;  %v4865_v13 = vld [vmem:[#allocation13_spill] sm:$0xff]  ;;  %v4866_v10 = vld [vmem:[#allocation14_spill] sm:$0xff] }
 0x659   :  { %2886 = vmatprep.subr.mxu0 %v4139_v20  ;;  %2957 = vmatprep.subr.mxu1 %v4142_v9  ;;  %v4867_v20 = vld [vmem:[#allocation15_spill] sm:$0xff]  ;;  %v4868_v9 = vld [vmem:[#allocation16_spill] sm:$0xff] }
 0x65a   :  { %2887 = vmatpush1.msra.mxu0 %v4145_v3  ;;  %2958 = vmatpush1.msra.mxu1 %v4148_v4  ;;  %v4869_v3 = vld [vmem:[#allocation17_spill] sm:$0xff] }
 0x65b   :  { %2888 = vmatprep.subr.mxu0 %v4151_v31  ;;  %2959 = vmatprep.subr.mxu1 %v4154_v32  ;;  %v4870_v4 = vld [vmem:[#allocation9_spill] sm:$0xff]  ;;  %v4871_v31 = vld [vmem:[#allocation10_spill] sm:$0xff] }
 0x65c   :  { %2889 = vmatpush1.msra.mxu0 %v4157_v33  ;;  %2960 = vmatpush1.msra.mxu1 %v4160_v34  ;;  %v4872_v32 = vld [vmem:[#allocation38_spill] sm:$0xff]  ;;  %v4873_v33 = vld [vmem:[#allocation39_spill] sm:$0xff] }
 0x65d   :  { %2890 = vmatprep.subr.mxu0 %v4163_v35  ;;  %2961 = vmatprep.subr.mxu1 %v4166_v36  ;;  %v4874_v34 = vld [vmem:[#allocation18_spill] sm:$0xff]  ;;  %v4875_v35 = vld [vmem:[#allocation19_spill] sm:$0xff]  ;;  %v4876_v36 = vld [vmem:[#allocation20_spill] sm:$0xff] }
 0x65e   :  { %2891 = vmatpush1.msra.mxu0 %v4169_v37  ;;  %2962 = vmatpush1.msra.mxu1 %v4172_v38  ;;  %v4877_v37 = vld [vmem:[#allocation21_spill] sm:$0xff]  ;;  %v4878_v38 = vld [vmem:[#allocation22_spill] sm:$0xff] }
 0x65f   :  { %2892 = vmatprep.subr.mxu0 %v4175_v39  ;;  %2963 = vmatprep.subr.mxu1 %v4178_v40  ;;  %v4879_v39 = vld [vmem:[#allocation23_spill] sm:$0xff]  ;;  %v4880_v40 = vld [vmem:[#allocation24_spill] sm:$0xff] }
 0x660   :  { %2893 = vmatpush1.msra.mxu0 %v4181_v41  ;;  %2964 = vmatpush1.msra.mxu1 %v4184_v42  ;;  %v4881_v41 = vld [vmem:[#allocation25_spill] sm:$0xff]  ;;  %v4882_v42 = vld [vmem:[#allocation26_spill] sm:$0xff] }
 0x661   :  { %2894 = vmatprep.subr.mxu0 %v4187_v43  ;;  %2965 = vmatprep.subr.mxu1 %v4190_v44  ;;  %v4883_v43 = vld [vmem:[#allocation27_spill] sm:$0xff]  ;;  %v4884_v44 = vmov 0.0  }
 0x662   :  { %2895 = vmatpush1.msra.mxu0 %v4193_v45  ;;  %2966 = vmatpush1.msra.mxu1 %v4196_v46  ;;  %v4885_v45 = vld [vmem:[#allocation28_spill] sm:$0xff] }
 0x663   :  { %2896 = vmatprep.subr.mxu0 %v4199_v47  ;;  %2967 = vmatprep.subr.mxu1 %v4202_v48 }
 0x664   :  { %2897 = vmatpush1.msra.mxu0 %v4205_v49  ;;  %2968 = vmatpush1.msra.mxu1 %v4208_v51 }
 0x665   :  { %2898 = vmatprep.subr.mxu0 %v4211_v54  ;;  %2969 = vmatprep.subr.mxu1 %v4214_v55 }
 0x666   :  { %2899 = vmatpush1.msra.mxu0 %v4217_v56  ;;  %2970 = vmatpush1.msra.mxu1 %v4220_v57 }
 0x667   :  { %2900 = vmatprep.subr.mxu0 %v4223_v58  ;;  %2971 = vmatprep.subr.mxu1 %v4226_v59  ;;  %v4886_v58 = vld [vmem:[#allocation48_spill] sm:$0xff]  ;;  %v4887_v59 = vld [vmem:[#allocation49_spill] sm:$0xff] }
 0x668   :  { %2901 = vmatpush1.msra.mxu0 %v4229_v60  ;;  %2972 = vmatpush1.msra.mxu1 %v4232_v61  ;;  %v4888_v60 = vcombine.low %v4886_v58, %v4887_v59 }
 0x669   :  { %2902 = vmatprep.subr.mxu0 %v4235_v62  ;;  %2973 = vmatprep.subr.mxu1 %v4238_v63 }
 0x66a   :  { %2903 = vmatpush1.msra.mxu0 %v4241_v1  ;;  %2974 = vmatpush1.msra.mxu1 %v4244_v2 }
 0x66b   :  { %2904 = vmatprep.subr.mxu0 %v4247_v28  ;;  %2975 = vmatprep.subr.mxu1 %v4250_v21 }
 0x66c   :  { %2905 = vmatpush1.msra.mxu0 %v4253_v26  ;;  %2976 = vmatpush1.msra.mxu1 %v4256_v30 }
 0x66d   :  { %2906 = vmatprep.subr.mxu0 %v4865_v13  ;;  %2977 = vmatprep.subr.mxu1 %v4866_v10  ;;  %v4889_v10 = vld [vmem:[#allocation50_spill] sm:$0xff] }
 0x66e   :  { %2907 = vmatpush1.msra.mxu0 %v4867_v20  ;;  %2978 = vmatpush1.msra.mxu1 %v4868_v9  ;;  %v4890_v20 = vld [vmem:[#allocation51_spill] sm:$0xff] }
 0x66f   :  { %2908 = vmatprep.subr.mxu0 %v4869_v3  ;;  %2979 = vmatprep.subr.mxu1 %v4870_v4  ;;  %v4891_v9 = vcombine.low %v4889_v10, %v4890_v20 }
 0x670   :  { %2909 = vmatpush1.msra.mxu0 %v4871_v31  ;;  %2980 = vmatpush1.msra.mxu1 %v4872_v32 }
 0x671   :  { %2910 = vmatprep.subr.mxu0 %v4873_v33  ;;  %2981 = vmatprep.subr.mxu1 %v4874_v34 }
 0x672   :  { %2911 = vmatpush1.msra.mxu0 %v4875_v35  ;;  %2982 = vmatpush1.msra.mxu1 %v4876_v36 }
 0x673   :  { %2912 = vmatprep.subr.mxu0 %v4877_v37  ;;  %2983 = vmatprep.subr.mxu1 %v4878_v38 }
 0x674   :  { %2913 = vmatpush1.msra.mxu0 %v4879_v39  ;;  %2984 = vmatpush1.msra.mxu1 %v4880_v40 }
 0x675   :  { %2914 = vmatprep.subr.mxu0 %v4881_v41  ;;  %2985 = vmatprep.subr.mxu1 %v4882_v42 }
 0x676   :  { %2915 = vmatpush1.msra.mxu0 %v4883_v43  ;;  %2948 = vmatprep.mubr.f32.mxu0 %v4884_v44 }
 0x677   :  { %2986 = vmatpush1.msra.mxu1 %v4885_v45  ;;  %3019 = vmatprep.mubr.f32.mxu1 %v4884_v44 }
 0x717   :  { %v2753_v46 = vpop.f32.mrf.mxu0  ;;  %v2824_v47 = vpop.f32.mrf.mxu1 }
 0x719   :  { %v2755_v48 = vpop.f32.mrf.mxu0  ;;  %v2826_v49 = vpop.f32.mrf.mxu1 }
 0x71a   :  { %v2833_v51 = vcombine.low %v2753_v46, %v2755_v48  ;;  %v2834_v54 = vcombine.low %v2824_v47, %v2826_v49 }
 0x71c   :  { %v2841_v55 = vrot.slane %v2833_v51, %v3882_v7  ;;  %v2848_v56 = vrot.slane %v2834_v54, %v3882_v7 }
 0x71e   :  { %v2849_v57 = vcombine.low %v2841_v55, %v2848_v56 }
 0x720   :  { %v2851_v61 = vadd.f32 %v2849_v57, %v4888_v60 }
 0x722   :  { %v3163_v62 = vmul.f32 -1.442695, %v2851_v61  ;;  %v2859_v63 = vrot.slane %v2851_v61, 2  ;;  %v2870_v2 = vrot.slane %v2851_v61, 6  ;;  %v2867_v26 = vrot.slane %v2851_v61, 4 }
 0x724   :  { %3273 = vpow2.f32 %v3163_v62  ;;  %v3164_v1 = vmul.f32 -1.442695, %v2859_v63  ;;  %v3165_v28 = vmul.f32 -1.442695, %v2870_v2 }
 0x726   :  { %3275 = vpow2.f32 %v3164_v1 }
 0x727   :  { %3277 = vpow2.f32 %v3165_v28 }
 0x731   :  { %v3274_v21 = vpop.eup %3273 }
 0x732   :  { %v2855_v30 = vadd.f32 1.0, %v3274_v21 }
 0x733   :  { %v3276_v14 = vpop.eup %3275 }
 0x734   :  { %3279 = vrcp.f32 %v2855_v30  ;;  %v2864_v52 = vadd.f32 1.0, %v3276_v14  ;;  %v3278_v23 = vpop.eup %3277 }
 0x735   :  { %3281 = vtanh.f32 %v2867_v26  ;;  %v2875_v25 = vadd.f32 1.0, %v3278_v23 }
 0x736   :  { %3283 = vrcp.f32 %v2864_v52 }
 0x737   :  { %3285 = vrcp.f32 %v2875_v25 }
 0x741   :  { %v3280_v11 = vpop.eup %3279 }
 0x742   :  { %v3282_v5 = vpop.eup %3281 }
 0x743   :  { %v3284_v50 = vpop.eup %3283  ;;  %v2879_v22 = vmul.f32 %v3282_v5, %v3280_v11 }
 0x744   :  { %v2878_v29 = vmul.f32 %v3284_v50, %v4479_v12  ;;  %v3286_v17 = vpop.eup %3285 }
 0x746   :  { %v2880_v18 = vadd.f32 %v2879_v22, %v2878_v29 }
 0x748   :  { %3287 = vtanh.f32 %v2880_v18 }
 0x755   :  { %v3288_v19 = vpop.eup %3287 }
 0x756   :  { %v2882_v6 = vmul.f32 %v3288_v19, %v3286_v17 }
 0x758   :  { %2949 = vmatmul.mubr.f32.vlgmr.msra.gmra.mxu0 %v2882_v6  ;;  %3020 = vmatmul.mubr.f32.vlgmr.msra.gmra.mxu1 %v2882_v6 }
 0x818   :  { %v2950_v24 = vpop.f32.mrf.mxu0  ;;  %v3021_v27 = vpop.f32.mrf.mxu1 }
 0x81a   :  { %v2952_v16 = vpop.f32.mrf.mxu0  ;;  %v3023_v8 = vpop.f32.mrf.mxu1 }
 0x81b   :  { %v3030_v0 = vcombine.low %v2950_v24, %v2952_v16  ;;  %v3031_v53 = vcombine.low %v3021_v27, %v3023_v8 }
 0x81d   :  { %v3038_v15 = vrot.slane %v3030_v0, %v3882_v7  ;;  %v3045_v13 = vrot.slane %v3031_v53, %v3882_v7 }
 0x81f   :  { %v3046_v12 = vcombine.low %v3038_v15, %v3045_v13 }
 0x821   :  { %v3048_v3 = vadd.f32 %v3046_v12, %v4891_v9 }
 0x823   :  { %v3166_v4 = vmul.f32 -1.442695, %v3048_v3  ;;  %v3056_v31 = vrot.slane %v3048_v3, 2  ;;  %v3067_v33 = vrot.slane %v3048_v3, 6  ;;  %v3064_v36 = vrot.slane %v3048_v3, 4 }
 0x825   :  { %3289 = vpow2.f32 %v3166_v4  ;;  %v3167_v32 = vmul.f32 -1.442695, %v3056_v31  ;;  %v3168_v34 = vmul.f32 -1.442695, %v3067_v33 }
 0x827   :  { %3291 = vpow2.f32 %v3167_v32 }
 0x828   :  { %3293 = vpow2.f32 %v3168_v34 }
 0x832   :  { %v3290_v35 = vpop.eup %3289 }
 0x833   :  { %v3052_v37 = vadd.f32 1.0, %v3290_v35 }
 0x834   :  { %v3292_v38 = vpop.eup %3291 }
 0x835   :  { %3295 = vrcp.f32 %v3052_v37  ;;  %v3061_v39 = vadd.f32 1.0, %v3292_v38  ;;  %v3294_v7 = vpop.eup %3293 }
 0x836   :  { %3297 = vtanh.f32 %v3064_v36  ;;  %v3072_v43 = vadd.f32 1.0, %v3294_v7 }
 0x837   :  { %3299 = vrcp.f32 %v3061_v39 }
 0x838   :  { %3301 = vrcp.f32 %v3072_v43 }
 0x842   :  { %v3296_v40 = vpop.eup %3295 }
 0x843   :  { %v3298_v41 = vpop.eup %3297 }
 0x844   :  { %v3300_v42 = vpop.eup %3299  ;;  %v3076_v45 = vmul.f32 %v3298_v41, %v3296_v40 }
 0x845   :  { %v3075_v44 = vmul.f32 %v3300_v42, %v2880_v18  ;;  %v3302_v47 = vpop.eup %3301 }
 0x847   :  { %v3077_v46 = vadd.f32 %v3076_v45, %v3075_v44 }
 0x849   :  { %3303 = vtanh.f32 %v3077_v46 }
 0x856   :  { %v3304_v48 = vpop.eup %3303 }
 0x857   :  { %v3079_v49 = vmul.f32 %v3304_v48, %v3302_v47 }
 0x859   :  { %3081 = vst.msk [vmem:[#allocation6] sm:$0x3] %vm3080_vm3, %v3079_v49 }
 0x85a   :  { %3400 = shalt.err (!%p3397_p9)
}
 0x85b   :  { %3091 = dma.vmem_to_hbm [thread:$0]  %s3089_s29, 32, %s4564_s4, [#allocation5]  }
 0x85c   :  { %3411 = dma.done.wait [#allocation5], 32  }
 0x85d   :  { %3412 = vsyncadd [#allocation5], 4294967264 }
 0x85e   :  { %3095 = vsyncpa [#allocation4], 1 }
 0x85f   :  { %3096 = vsyncpa [#allocation5], 1 }

</bundles_post_ra>
